<compile_context>
chip_gen: v7x
topology: tpu7x:2x2x1
jax: 0.10.0
libtpu: 0.0.40
codegen_flags: <defaults>
</compile_context>

<pallas_src>
import functools

import numpy as np
import jax
import jax.numpy as jnp
from jax import lax
from jax.experimental import pallas as pl
from jax.experimental.pallas import tpu as pltpu

BN_EPS = 1e-5

_VMEM_TILE_BUDGET = 12 * 1024 * 1024   # tile-selection budget for the pipelined streams
_VMEM_LIMIT_BYTES = 32 * 1024 * 1024   # explicit scoped-VMEM limit (safe on v5e/v6e/v7x)
_MIN_PALLAS_M = 512                    # below this a pallas_call is pure fixed overhead
_TM_CANDIDATES = (4096, 2048, 1024, 512, 256, 128)


# ----------------------------- Pallas kernels --------------------------------

def _convmm_kernel(w_ref, a_ref, shift_ref, o_ref, *, relu):
    # out^T = W_eff^T @ patches^T : bf16 operands, f32 MXU accumulation.
    acc = jnp.dot(w_ref[...], a_ref[...], preferred_element_type=jnp.float32)
    acc = acc + shift_ref[...]                     # (N,1) broadcast over lanes
    if relu:
        acc = jnp.maximum(acc, 0.0)
    o_ref[...] = acc.astype(o_ref.dtype)


def _convmm_fused_sc_kernel(w_ref, a_ref, wsc_ref, asc_ref, shift_ref, o_ref, *, relu):
    # conv2 + fused 1x1x1 shortcut: second tiny dot is free (MXU has huge slack
    # at Cout <= 16 rows); shift already holds BN2-shift + BNsc-shift.
    acc = jnp.dot(w_ref[...], a_ref[...], preferred_element_type=jnp.float32)
    acc = acc + jnp.dot(wsc_ref[...], asc_ref[...], preferred_element_type=jnp.float32)
    acc = acc + shift_ref[...]
    if relu:
        acc = jnp.maximum(acc, 0.0)
    o_ref[...] = acc.astype(o_ref.dtype)


# ----------------------------- tiling helpers --------------------------------

def _pad_to(v, mult):
    return ((v + mult - 1) // mult) * mult


def _pick_tm(m, bytes_per_col, fixed_bytes):
    """Largest lane tile (multiple of 128) dividing M that fits the VMEM budget.

    All pipelined streams are double-buffered (factor 2).  When M >= 1024 we
    keep at least two grid steps so the 'parallel' M axis can be sharded across
    both TensorCores on v7x; at >= 512-lane tiles the extra step costs ~0.35us
    on v5e/v6e (already >= 85% of mem-bound roofline).
    """
    fits = [t for t in _TM_CANDIDATES
            if m % t == 0 and 2 * t * bytes_per_col + fixed_bytes <= _VMEM_TILE_BUDGET]
    if not fits:
        return None
    if m >= 1024:
        for t in fits:
            if t < m:          # largest tile that still leaves >= 2 grid steps
                return t
    return fits[0]


def conv_matmul_t(w_t, a_t, shift, sc=None, relu=False, out_dtype=jnp.bfloat16):
    """maybe_relu(w_t @ a_t [+ wsc_t @ asc_t] + shift), lane-dense (N, M) output.

    w_t:   (N, K)     effective conv weight (BN scale folded), any float dtype
    a_t:   (K, M)     patches^T, M = B*Do*Ho*Wo (lane axis)
    shift: (N,)       folded BN shift (conv2 path: BN2 shift + shortcut BN shift)
    sc:    optional (wsc_t (N, Cin), asc_t (Cin, M)) fused 1x1x1 shortcut branch
    returns (N, M) in `out_dtype` (bf16 by default).
    """
    n, k = w_t.shape
    k2, m = a_t.shape
    assert k == k2
    w_t = w_t.astype(jnp.bfloat16)
    a_t = a_t.astype(jnp.bfloat16)
    shift_col = shift.reshape(n, 1).astype(jnp.float32)
    if sc is not None:
        wsc_t, asc_t = sc
        cin = wsc_t.shape[1]
        assert wsc_t.shape == (n, cin) and asc_t.shape == (cin, m)
        wsc_t = wsc_t.astype(jnp.bfloat16)
        asc_t = asc_t.astype(jnp.bfloat16)
    else:
        cin = 0

    # Double-buffered per-lane-column stream bytes (bf16 in / bf16 out) plus the
    # grid-invariant resident blocks (weights padded to (8,128) tiles, shift).
    bytes_per_col = 2 * k + 2 * n + (2 * cin if sc is not None else 0)
    fixed_bytes = (2 * _pad_to(n, 8) * _pad_to(k, 128)
                   + (2 * _pad_to(n, 8) * _pad_to(cin, 128) if sc is not None else 0)
                   + 4 * _pad_to(n, 8) * 128)

    tm = None
    if m % 128 == 0 and m >= _MIN_PALLAS_M:
        tm = _pick_tm(m, bytes_per_col, fixed_bytes)

    if tm is None:
        # XLA fallback: M too small / ragged for lane-dense tiles (last residual
        # block has M = 64) or tile would bust the VMEM budget.  Same math.
        acc = jnp.dot(w_t, a_t, preferred_element_type=jnp.float32)
        if sc is not None:
            acc = acc + jnp.dot(wsc_t, asc_t, preferred_element_type=jnp.float32)
        acc = acc + shift_col
        if relu:
            acc = jnp.maximum(acc, 0.0)
        return acc.astype(out_dtype)

    if sc is not None:
        kern = functools.partial(_convmm_fused_sc_kernel, relu=relu)
        in_specs = [
            pl.BlockSpec((n, k), lambda i: (0, 0)),     # conv weight (grid-invariant)
            pl.BlockSpec((k, tm), lambda i: (0, i)),    # patches^T tile (lane-dense)
            pl.BlockSpec((n, cin), lambda i: (0, 0)),   # shortcut weight (grid-invariant)
            pl.BlockSpec((cin, tm), lambda i: (0, i)),  # shortcut activation tile
            pl.BlockSpec((n, 1), lambda i: (0, 0)),     # folded BN shifts
        ]
        args = (w_t, a_t, wsc_t, asc_t, shift_col)
    else:
        kern = functools.partial(_convmm_kernel, relu=relu)
        in_specs = [
            pl.BlockSpec((n, k), lambda i: (0, 0)),
            pl.BlockSpec((k, tm), lambda i: (0, i)),
            pl.BlockSpec((n, 1), lambda i: (0, 0)),
        ]
        args = (w_t, a_t, shift_col)

    flops = 2 * n * m * (k + cin)
    bytes_accessed = (2 * k * m + 2 * n * m + 2 * n * k + 4 * n
                      + (2 * cin * m + 2 * n * cin if sc is not None else 0))

    return pl.pallas_call(
        kern,
        out_shape=jax.ShapeDtypeStruct((n, m), out_dtype),
        grid_spec=pltpu.PrefetchScalarGridSpec(
            num_scalar_prefetch=0,
            grid=(m // tm,),
            in_specs=in_specs,
            out_specs=pl.BlockSpec((n, tm), lambda i: (0, i)),   # lane-dense stores
        ),
        compiler_params=pltpu.CompilerParams(
            dimension_semantics=("parallel",),
            vmem_limit_bytes=_VMEM_LIMIT_BYTES),
        cost_estimate=pl.CostEstimate(flops=flops, transcendentals=0,
                                      bytes_accessed=bytes_accessed),
    )(*args)


# ----------------------------- JAX glue (im2col^T etc.) ----------------------

def _out_size(n, k, s, p):
    return (n + 2 * p - k) // s + 1


def im2col3d_t(x, ksize, stride, padding):
    """x: (C, B, D, H, W) -> patches^T (C*k^3, B*Do*Ho*Wo) in bf16.

    K order is (tap, C) with tap = kd*k^2 + kh*k + kw; M order is (B, Do, Ho, Wo).
    The stack already produces the target layout, so no transpose copy is needed.
    """
    C, B, D, H, W = x.shape
    Do = _out_size(D, ksize, stride, padding)
    Ho = _out_size(H, ksize, stride, padding)
    Wo = _out_size(W, ksize, stride, padding)
    xp = jnp.pad(x, ((0, 0), (0, 0), (padding,) * 2, (padding,) * 2,
                     (padding,) * 2)).astype(jnp.bfloat16)
    cols = []
    for kd in range(ksize):
        for kh in range(ksize):
            for kw in range(ksize):
                cols.append(xp[:, :,
                               kd:kd + stride * Do:stride,
                               kh:kh + stride * Ho:stride,
                               kw:kw + stride * Wo:stride])
    a_t = jnp.stack(cols, axis=0).reshape(ksize ** 3 * C, B * Do * Ho * Wo)
    return a_t, (B, Do, Ho, Wo)


def _w_to_wt(w):
    """(Cout, Cin, kd, kh, kw) -> (Cout, k^3*Cin), K ordered (tap, Cin)."""
    cout = w.shape[0]
    return jnp.transpose(w, (0, 2, 3, 4, 1)).reshape(cout, -1)


def bn_fold(c):
    # PyTorch BatchNorm defaults at eval: gamma=1, beta=0, mean=0, var=1.
    gamma = jnp.ones((c,), jnp.float32)
    beta = jnp.zeros((c,), jnp.float32)
    mean = jnp.zeros((c,), jnp.float32)
    var = jnp.ones((c,), jnp.float32)
    s = gamma / jnp.sqrt(var + BN_EPS)
    return s, beta - mean * s


# ----------------------------- Res3d block ------------------------------------

def init_res3d(key, cin, cout):
    k1, k2, k3 = jax.random.split(key, 3)
    return {
        'w1': jax.random.normal(k1, (cout, cin, 3, 3, 3), jnp.float32) * 0.1,
        'w2': jax.random.normal(k2, (cout, cout, 3, 3, 3), jnp.float32) * 0.1,
        'wsc': jax.random.normal(k3, (cout, cin, 1, 1, 1), jnp.float32) * 0.1,
        'bn1': bn_fold(cout),
        'bn2': bn_fold(cout),
        'bnsc': bn_fold(cout),
    }


def res3d_fwd(x, p, stride):
    """x: (Cin, B, D, H, W) bf16 -> (Cout, B, Do, Ho, Wo) bf16."""
    cout, cin = p['w1'].shape[0], p['w1'].shape[1]
    s1, b1 = p['bn1']
    s2, b2 = p['bn2']
    ssc, bsc = p['bnsc']

    # conv1 (3x3x3, stride) + BN1 + ReLU   (Dropout: eval-mode identity)
    a1, dims = im2col3d_t(x, 3, stride, 1)
    w1t = _w_to_wt(p['w1']) * s1[:, None]          # fold BN scale into weight rows
    out1 = conv_matmul_t(w1t, a1, b1, relu=True)   # (Cout, M1) bf16
    B, Do, Ho, Wo = dims
    out1 = out1.reshape(cout, B, Do, Ho, Wo)

    # conv2 (3x3x3, 1) + BN2 + fused 1x1x1 strided shortcut + ReLU: ONE pallas_call.
    a2, dims2 = im2col3d_t(out1, 3, 1, 1)
    a_sc = x[:, :, ::stride, ::stride, ::stride].reshape(cin, -1)   # same M order
    w2t = _w_to_wt(p['w2']) * s2[:, None]
    wsct = p['wsc'].reshape(cout, cin) * ssc[:, None]
    out2 = conv_matmul_t(w2t, a2, b2 + bsc, sc=(wsct, a_sc), relu=True)
    B2, Do2, Ho2, Wo2 = dims2
    return out2.reshape(cout, B2, Do2, Ho2, Wo2)


# ----------------------------- full model -------------------------------------

def pure3d_init(key, in_channel, head_channel, res_num, in_size, seq, cls_size):
    keys = jax.random.split(key, res_num + 2)
    params = {'head': init_res3d(keys[0], in_channel, head_channel)}
    ch, num, sq = head_channel, in_size, seq
    layers = []
    for i in range(res_num):
        layers.append(init_res3d(keys[i + 1], ch, ch * 2))
        ch *= 2
        num = (num + 1) // 2
        sq = (sq + 1) // 2
    params['res'] = layers
    feat = ch * sq * num * num
    kw, kb = jax.random.split(keys[-1])
    bound = 1.0 / np.sqrt(feat)
    params['fc_w'] = jax.random.uniform(kw, (cls_size, feat), jnp.float32, -bound, bound)
    params['fc_b'] = jax.random.uniform(kb, (cls_size,), jnp.float32, -bound, bound)
    params['fc_bn'] = bn_fold(feat)
    return params


def pure3d_fwd(params, x):
    # x: (B, seq, C_in, H, W); torch transpose(1,2) -> NCDHW; we carry (C, B, D, H, W)
    # in bf16 between layers (kernels accumulate in f32, store bf16).
    act = jnp.transpose(x, (2, 0, 1, 3, 4)).astype(jnp.bfloat16)
    act = res3d_fwd(act, params['head'], stride=1)
    for p in params['res']:
        act = res3d_fwd(act, p, stride=2)
    # Flatten in PyTorch NCDHW order: (B, C*D*H*W)
    flat = jnp.transpose(act, (1, 0, 2, 3, 4)).reshape(act.shape[1], -1)
    flat = flat.astype(jnp.float32)
    s, sh = params['fc_bn']                        # fold BatchNorm1d
    flat = flat * s[None, :] + sh[None, :]
    # Final FC in plain XLA: M = batch, N = cls are far too small for Pallas to help.
    return (jnp.dot(flat, params['fc_w'].T, preferred_element_type=jnp.float32)
            + params['fc_b'][None, :])


# ----------------------------- pure-JAX reference -----------------------------
# Reference uses the same precision semantics as the kernel path (bf16 operands,
# f32 accumulation) so the comparison only measures algorithmic correctness.

def _conv3d_ref(x, w, stride, padding):
    return lax.conv_general_dilated(
        x.astype(jnp.bfloat16), w.astype(jnp.bfloat16),
        (stride,) * 3, [(padding, padding)] * 3,
        dimension_numbers=('NCDHW', 'OIDHW', 'NCDHW'),
        preferred_element_type=jnp.float32)


def _c(v):
    return v[None, :, None, None, None]


def res3d_ref(x, p, stride):
    s1, b1 = p['bn1']; s2, b2 = p['bn2']; ssc, bsc = p['bnsc']
    o = _conv3d_ref(x, p['w1'], stride, 1)
    o = jnp.maximum(o * _c(s1) + _c(b1), 0.0)
    sc = _conv3d_ref(x, p['wsc'], stride, 0)
    sc = sc * _c(ssc) + _c(bsc)
    o = _conv3d_ref(o, p['w2'], 1, 1)
    o = o * _c(s2) + _c(b2)
    return jnp.maximum(o + sc, 0.0)


def pure3d_ref(params, x):
    x = jnp.transpose(x, (0, 2, 1, 3, 4))          # NCDHW
    out = res3d_ref(x, params['head'], 1)
    for p in params['res']:
        out = res3d_ref(out, p, 2)
    flat = out.reshape(out.shape[0], -1)
    s, sh = params['fc_bn']
    flat = flat * s[None, :] + sh[None, :]
    return (jnp.dot(flat, params['fc_w'].T, preferred_element_type=jnp.float32)
            + params['fc_b'][None, :])


# ----------------------------- main --------------------------------------------

if __name__ == "__main__":
    # Small config consistent with the module's forward:
    # x: (batch, seq, in_channel, in_size, in_size)
    B, SEQ, CIN, SIZE = 2, 8, 1, 16
    HEAD_CH, RES_NUM, CLS = 4, 2, 10

    key = jax.random.PRNGKey(0)
    kp, kx = jax.random.split(key)
    params = pure3d_init(kp, CIN, HEAD_CH, RES_NUM, SIZE, SEQ, CLS)
    x = jax.random.normal(kx, (B, SEQ, CIN, SIZE, SIZE), jnp.float32)

    out = jax.block_until_ready(jax.jit(pure3d_fwd)(params, x))
    ref = jax.block_until_ready(jax.jit(pure3d_ref)(params, x))

    assert out.shape == (B, CLS)
    np.testing.assert_allclose(np.asarray(out), np.asarray(ref), rtol=2e-2, atol=2e-2)
    # TODO(synk): Dropout (train mode) and BatchNorm running-stat updates are not
    # modeled; this implements the eval-mode forward pass only.
    print("KERNEL_OK")
</pallas_src>

<mosaic_0001>
module attributes {stable_mosaic.version = 11 : i64} {
  func.func @_convmm_kernel(%arg0: i32, %arg1: memref<4x27xbf16, #tpu.memory_space<vmem>>, %arg2: memref<27x2048xbf16, #tpu.memory_space<vmem>>, %arg3: memref<4x1xf32, #tpu.memory_space<vmem>>, %arg4: memref<4x2048xbf16, #tpu.memory_space<vmem>>) attributes {dimension_semantics = [#tpu.dimension_semantics<parallel>], iteration_bounds = array<i64: 2>, scalar_prefetch = 0 : i64, scratch_operands = 0 : i64, tpu.core_type = #tpu.core_type<tc>, window_params = [{pipeline_mode = #tpu.pipeline_mode<synchronous>, transform_indices = @transform_0, window_bounds = array<i64: 4, 27>}, {transform_indices = @transform_1, window_bounds = array<i64: 27, 2048>}, {pipeline_mode = #tpu.pipeline_mode<synchronous>, transform_indices = @transform_2, window_bounds = array<i64: 4, 1>}, {transform_indices = @transform_3, window_bounds = array<i64: 4, 2048>}]} {
    %c0 = arith.constant 0 : index
    %c0_0 = arith.constant 0 : index
    %0 = vector.load %arg1[%c0, %c0_0] : memref<4x27xbf16, #tpu.memory_space<vmem>>, vector<4x27xbf16>
    %c0_1 = arith.constant 0 : index
    %c0_2 = arith.constant 0 : index
    %1 = vector.load %arg2[%c0_1, %c0_2] : memref<27x2048xbf16, #tpu.memory_space<vmem>>, vector<27x2048xbf16>
    %cst = arith.constant dense<0.000000e+00> : vector<4x2048xf32>
    %2 = tpu.matmul %0, %1, %cst {dimension_numbers = #tpu.dot_dimension_numbers<[1], [0], [0], [1], [0, 0, 1, 1], [], []>} : vector<4x27xbf16>, vector<27x2048xbf16>, vector<4x2048xf32> -> vector<4x2048xf32>
    %c0_3 = arith.constant 0 : index
    %c0_4 = arith.constant 0 : index
    %3 = vector.load %arg3[%c0_3, %c0_4] : memref<4x1xf32, #tpu.memory_space<vmem>>, vector<4x1xf32>
    %4 = vector.broadcast %3 : vector<4x1xf32> to vector<4x2048xf32>
    %5 = arith.addf %2, %4 : vector<4x2048xf32>
    %cst_5 = arith.constant 0.000000e+00 : f32
    %6 = vector.broadcast %cst_5 : f32 to vector<4x2048xf32>
    %7 = arith.maximumf %5, %6 : vector<4x2048xf32>
    %8 = arith.truncf %7 : vector<4x2048xf32> to vector<4x2048xbf16>
    %c0_6 = arith.constant 0 : index
    %c0_7 = arith.constant 0 : index
    %9 = vector.load %arg4[%c0_6, %c0_7] : memref<4x2048xbf16, #tpu.memory_space<vmem>>, vector<4x2048xbf16>
    tpu.vector_store %arg4[%c0_6, %c0_7], %8 {strides = array<i32>} : memref<4x2048xbf16, #tpu.memory_space<vmem>>, vector<4x2048xbf16>,
    return
  }
  func.func @transform_0(%arg0: i32) -> (i32, i32) {
    %c0_i32 = arith.constant 0 : i32
    %c0_i32_0 = arith.constant 0 : i32
    %c0_i32_1 = arith.constant 0 : i32
    return %c0_i32, %c0_i32_0 : i32, i32
  }
  func.func @transform_1(%arg0: i32) -> (i32, i32) {
    %c0_i32 = arith.constant 0 : i32
    %c0_i32_0 = arith.constant 0 : i32
    return %c0_i32, %arg0 : i32, i32
  }
  func.func @transform_2(%arg0: i32) -> (i32, i32) {
    %c0_i32 = arith.constant 0 : i32
    %c0_i32_0 = arith.constant 0 : i32
    %c0_i32_1 = arith.constant 0 : i32
    return %c0_i32, %c0_i32_0 : i32, i32
  }
  func.func @transform_3(%arg0: i32) -> (i32, i32) {
    %c0_i32 = arith.constant 0 : i32
    %c0_i32_0 = arith.constant 0 : i32
    return %c0_i32, %arg0 : i32, i32
  }
}

module attributes {stable_mosaic.version = 11 : i64} {
  func.func @_convmm_fused_sc_kernel(%arg0: i32, %arg1: memref<4x108xbf16, #tpu.memory_space<vmem>>, %arg2: memref<108x2048xbf16, #tpu.memory_space<vmem>>, %arg3: memref<4x1xbf16, #tpu.memory_space<vmem>>, %arg4: memref<1x2048xbf16, #tpu.memory_space<vmem>>, %arg5: memref<4x1xf32, #tpu.memory_space<vmem>>, %arg6: memref<4x2048xbf16, #tpu.memory_space<vmem>>) attributes {dimension_semantics = [#tpu.dimension_semantics<parallel>], iteration_bounds = array<i64: 2>, scalar_prefetch = 0 : i64, scratch_operands = 0 : i64, tpu.core_type = #tpu.core_type<tc>, window_params = [{pipeline_mode = #tpu.pipeline_mode<synchronous>, transform_indices = @transform_0, window_bounds = array<i64: 4, 108>}, {transform_indices = @transform_1, window_bounds = array<i64: 108, 2048>}, {pipeline_mode = #tpu.pipeline_mode<synchronous>, transform_indices = @transform_2, window_bounds = array<i64: 4, 1>}, {transform_indices = @transform_3, window_bounds = array<i64: 1, 2048>}, {pipeline_mode = #tpu.pipeline_mode<synchronous>, transform_indices = @transform_4, window_bounds = array<i64: 4, 1>}, {transform_indices = @transform_5, window_bounds = array<i64: 4, 2048>}]} {
    %c0 = arith.constant 0 : index
    %c0_0 = arith.constant 0 : index
    %0 = vector.load %arg1[%c0, %c0_0] : memref<4x108xbf16, #tpu.memory_space<vmem>>, vector<4x108xbf16>
    %c0_1 = arith.constant 0 : index
    %c0_2 = arith.constant 0 : index
    %1 = vector.load %arg2[%c0_1, %c0_2] : memref<108x2048xbf16, #tpu.memory_space<vmem>>, vector<108x2048xbf16>
    %cst = arith.constant dense<0.000000e+00> : vector<4x2048xf32>
    %2 = tpu.matmul %0, %1, %cst {dimension_numbers = #tpu.dot_dimension_numbers<[1], [0], [0], [1], [0, 0, 1, 1], [], []>} : vector<4x108xbf16>, vector<108x2048xbf16>, vector<4x2048xf32> -> vector<4x2048xf32>
    %c0_3 = arith.constant 0 : index
    %c0_4 = arith.constant 0 : index
    %3 = vector.load %arg3[%c0_3, %c0_4] : memref<4x1xbf16, #tpu.memory_space<vmem>>, vector<4x1xbf16>
    %c0_5 = arith.constant 0 : index
    %c0_6 = arith.constant 0 : index
    %4 = vector.load %arg4[%c0_5, %c0_6] : memref<1x2048xbf16, #tpu.memory_space<vmem>>, vector<1x2048xbf16>
    %cst_7 = arith.constant dense<0.000000e+00> : vector<4x2048xf32>
    %5 = tpu.matmul %3, %4, %cst_7 {dimension_numbers = #tpu.dot_dimension_numbers<[1], [0], [0], [1], [0, 0, 1, 1], [], []>} : vector<4x1xbf16>, vector<1x2048xbf16>, vector<4x2048xf32> -> vector<4x2048xf32>
    %6 = arith.addf %2, %5 : vector<4x2048xf32>
    %c0_8 = arith.constant 0 : index
    %c0_9 = arith.constant 0 : index
    %7 = vector.load %arg5[%c0_8, %c0_9] : memref<4x1xf32, #tpu.memory_space<vmem>>, vector<4x1xf32>
    %8 = vector.broadcast %7 : vector<4x1xf32> to vector<4x2048xf32>
    %9 = arith.addf %6, %8 : vector<4x2048xf32>
    %cst_10 = arith.constant 0.000000e+00 : f32
    %10 = vector.broadcast %cst_10 : f32 to vector<4x2048xf32>
    %11 = arith.maximumf %9, %10 : vector<4x2048xf32>
    %12 = arith.truncf %11 : vector<4x2048xf32> to vector<4x2048xbf16>
    %c0_11 = arith.constant 0 : index
    %c0_12 = arith.constant 0 : index
    %13 = vector.load %arg6[%c0_11, %c0_12] : memref<4x2048xbf16, #tpu.memory_space<vmem>>, vector<4x2048xbf16>
    tpu.vector_store %arg6[%c0_11, %c0_12], %12 {strides = array<i32>} : memref<4x2048xbf16, #tpu.memory_space<vmem>>, vector<4x2048xbf16>,
    return
  }
  func.func @transform_0(%arg0: i32) -> (i32, i32) {
    %c0_i32 = arith.constant 0 : i32
    %c0_i32_0 = arith.constant 0 : i32
    %c0_i32_1 = arith.constant 0 : i32
    return %c0_i32, %c0_i32_0 : i32, i32
  }
  func.func @transform_1(%arg0: i32) -> (i32, i32) {
    %c0_i32 = arith.constant 0 : i32
    %c0_i32_0 = arith.constant 0 : i32
    return %c0_i32, %arg0 : i32, i32
  }
  func.func @transform_2(%arg0: i32) -> (i32, i32) {
    %c0_i32 = arith.constant 0 : i32
    %c0_i32_0 = arith.constant 0 : i32
    %c0_i32_1 = arith.constant 0 : i32
    return %c0_i32, %c0_i32_0 : i32, i32
  }
  func.func @transform_3(%arg0: i32) -> (i32, i32) {
    %c0_i32 = arith.constant 0 : i32
    %c0_i32_0 = arith.constant 0 : i32
    return %c0_i32, %arg0 : i32, i32
  }
  func.func @transform_4(%arg0: i32) -> (i32, i32) {
    %c0_i32 = arith.constant 0 : i32
    %c0_i32_0 = arith.constant 0 : i32
    %c0_i32_1 = arith.constant 0 : i32
    return %c0_i32, %c0_i32_0 : i32, i32
  }
  func.func @transform_5(%arg0: i32) -> (i32, i32) {
    %c0_i32 = arith.constant 0 : i32
    %c0_i32_0 = arith.constant 0 : i32
    return %c0_i32, %arg0 : i32, i32
  }
}

module attributes {stable_mosaic.version = 11 : i64} {
  func.func @_convmm_kernel(%arg0: i32, %arg1: memref<8x108xbf16, #tpu.memory_space<vmem>>, %arg2: memref<108x512xbf16, #tpu.memory_space<vmem>>, %arg3: memref<8x1xf32, #tpu.memory_space<vmem>>, %arg4: memref<8x512xbf16, #tpu.memory_space<vmem>>) attributes {dimension_semantics = [#tpu.dimension_semantics<parallel>], iteration_bounds = array<i64: 1>, scalar_prefetch = 0 : i64, scratch_operands = 0 : i64, tpu.core_type = #tpu.core_type<tc>, window_params = [{pipeline_mode = #tpu.pipeline_mode<synchronous>, transform_indices = @transform_0, window_bounds = array<i64: 8, 108>}, {transform_indices = @transform_1, window_bounds = array<i64: 108, 512>}, {pipeline_mode = #tpu.pipeline_mode<synchronous>, transform_indices = @transform_2, window_bounds = array<i64: 8, 1>}, {transform_indices = @transform_3, window_bounds = array<i64: 8, 512>}]} {
    %c0 = arith.constant 0 : index
    %c0_0 = arith.constant 0 : index
    %0 = vector.load %arg1[%c0, %c0_0] : memref<8x108xbf16, #tpu.memory_space<vmem>>, vector<8x108xbf16>
    %c0_1 = arith.constant 0 : index
    %c0_2 = arith.constant 0 : index
    %1 = vector.load %arg2[%c0_1, %c0_2] : memref<108x512xbf16, #tpu.memory_space<vmem>>, vector<108x512xbf16>
    %cst = arith.constant dense<0.000000e+00> : vector<8x512xf32>
    %2 = tpu.matmul %0, %1, %cst {dimension_numbers = #tpu.dot_dimension_numbers<[1], [0], [0], [1], [0, 0, 1, 1], [], []>} : vector<8x108xbf16>, vector<108x512xbf16>, vector<8x512xf32> -> vector<8x512xf32>
    %c0_3 = arith.constant 0 : index
    %c0_4 = arith.constant 0 : index
    %3 = vector.load %arg3[%c0_3, %c0_4] : memref<8x1xf32, #tpu.memory_space<vmem>>, vector<8x1xf32>
    %4 = vector.broadcast %3 : vector<8x1xf32> to vector<8x512xf32>
    %5 = arith.addf %2, %4 : vector<8x512xf32>
    %cst_5 = arith.constant 0.000000e+00 : f32
    %6 = vector.broadcast %cst_5 : f32 to vector<8x512xf32>
    %7 = arith.maximumf %5, %6 : vector<8x512xf32>
    %8 = arith.truncf %7 : vector<8x512xf32> to vector<8x512xbf16>
    %c0_6 = arith.constant 0 : index
    %c0_7 = arith.constant 0 : index
    %9 = vector.load %arg4[%c0_6, %c0_7] : memref<8x512xbf16, #tpu.memory_space<vmem>>, vector<8x512xbf16>
    tpu.vector_store %arg4[%c0_6, %c0_7], %8 {strides = array<i32>} : memref<8x512xbf16, #tpu.memory_space<vmem>>, vector<8x512xbf16>,
    return
  }
  func.func @transform_0(%arg0: i32) -> (i32, i32) {
    %c0_i32 = arith.constant 0 : i32
    %c0_i32_0 = arith.constant 0 : i32
    %c0_i32_1 = arith.constant 0 : i32
    return %c0_i32, %c0_i32_0 : i32, i32
  }
  func.func @transform_1(%arg0: i32) -> (i32, i32) {
    %c0_i32 = arith.constant 0 : i32
    %c0_i32_0 = arith.constant 0 : i32
    return %c0_i32, %arg0 : i32, i32
  }
  func.func @transform_2(%arg0: i32) -> (i32, i32) {
    %c0_i32 = arith.constant 0 : i32
    %c0_i32_0 = arith.constant 0 : i32
    %c0_i32_1 = arith.constant 0 : i32
    return %c0_i32, %c0_i32_0 : i32, i32
  }
  func.func @transform_3(%arg0: i32) -> (i32, i32) {
    %c0_i32 = arith.constant 0 : i32
    %c0_i32_0 = arith.constant 0 : i32
    return %c0_i32, %arg0 : i32, i32
  }
}

module attributes {stable_mosaic.version = 11 : i64} {
  func.func @_convmm_fused_sc_kernel(%arg0: i32, %arg1: memref<8x216xbf16, #tpu.memory_space<vmem>>, %arg2: memref<216x512xbf16, #tpu.memory_space<vmem>>, %arg3: memref<8x4xbf16, #tpu.memory_space<vmem>>, %arg4: memref<4x512xbf16, #tpu.memory_space<vmem>>, %arg5: memref<8x1xf32, #tpu.memory_space<vmem>>, %arg6: memref<8x512xbf16, #tpu.memory_space<vmem>>) attributes {dimension_semantics = [#tpu.dimension_semantics<parallel>], iteration_bounds = array<i64: 1>, scalar_prefetch = 0 : i64, scratch_operands = 0 : i64, tpu.core_type = #tpu.core_type<tc>, window_params = [{pipeline_mode = #tpu.pipeline_mode<synchronous>, transform_indices = @transform_0, window_bounds = array<i64: 8, 216>}, {transform_indices = @transform_1, window_bounds = array<i64: 216, 512>}, {pipeline_mode = #tpu.pipeline_mode<synchronous>, transform_indices = @transform_2, window_bounds = array<i64: 8, 4>}, {transform_indices = @transform_3, window_bounds = array<i64: 4, 512>}, {pipeline_mode = #tpu.pipeline_mode<synchronous>, transform_indices = @transform_4, window_bounds = array<i64: 8, 1>}, {transform_indices = @transform_5, window_bounds = array<i64: 8, 512>}]} {
    %c0 = arith.constant 0 : index
    %c0_0 = arith.constant 0 : index
    %0 = vector.load %arg1[%c0, %c0_0] : memref<8x216xbf16, #tpu.memory_space<vmem>>, vector<8x216xbf16>
    %c0_1 = arith.constant 0 : index
    %c0_2 = arith.constant 0 : index
    %1 = vector.load %arg2[%c0_1, %c0_2] : memref<216x512xbf16, #tpu.memory_space<vmem>>, vector<216x512xbf16>
    %cst = arith.constant dense<0.000000e+00> : vector<8x512xf32>
    %2 = tpu.matmul %0, %1, %cst {dimension_numbers = #tpu.dot_dimension_numbers<[1], [0], [0], [1], [0, 0, 1, 1], [], []>} : vector<8x216xbf16>, vector<216x512xbf16>, vector<8x512xf32> -> vector<8x512xf32>
    %c0_3 = arith.constant 0 : index
    %c0_4 = arith.constant 0 : index
    %3 = vector.load %arg3[%c0_3, %c0_4] : memref<8x4xbf16, #tpu.memory_space<vmem>>, vector<8x4xbf16>
    %c0_5 = arith.constant 0 : index
    %c0_6 = arith.constant 0 : index
    %4 = vector.load %arg4[%c0_5, %c0_6] : memref<4x512xbf16, #tpu.memory_space<vmem>>, vector<4x512xbf16>
    %cst_7 = arith.constant dense<0.000000e+00> : vector<8x512xf32>
    %5 = tpu.matmul %3, %4, %cst_7 {dimension_numbers = #tpu.dot_dimension_numbers<[1], [0], [0], [1], [0, 0, 1, 1], [], []>} : vector<8x4xbf16>, vector<4x512xbf16>, vector<8x512xf32> -> vector<8x512xf32>
    %6 = arith.addf %2, %5 : vector<8x512xf32>
    %c0_8 = arith.constant 0 : index
    %c0_9 = arith.constant 0 : index
    %7 = vector.load %arg5[%c0_8, %c0_9] : memref<8x1xf32, #tpu.memory_space<vmem>>, vector<8x1xf32>
    %8 = vector.broadcast %7 : vector<8x1xf32> to vector<8x512xf32>
    %9 = arith.addf %6, %8 : vector<8x512xf32>
    %cst_10 = arith.constant 0.000000e+00 : f32
    %10 = vector.broadcast %cst_10 : f32 to vector<8x512xf32>
    %11 = arith.maximumf %9, %10 : vector<8x512xf32>
    %12 = arith.truncf %11 : vector<8x512xf32> to vector<8x512xbf16>
    %c0_11 = arith.constant 0 : index
    %c0_12 = arith.constant 0 : index
    %13 = vector.load %arg6[%c0_11, %c0_12] : memref<8x512xbf16, #tpu.memory_space<vmem>>, vector<8x512xbf16>
    tpu.vector_store %arg6[%c0_11, %c0_12], %12 {strides = array<i32>} : memref<8x512xbf16, #tpu.memory_space<vmem>>, vector<8x512xbf16>,
    return
  }
  func.func @transform_0(%arg0: i32) -> (i32, i32) {
    %c0_i32 = arith.constant 0 : i32
    %c0_i32_0 = arith.constant 0 : i32
    %c0_i32_1 = arith.constant 0 : i32
    return %c0_i32, %c0_i32_0 : i32, i32
  }
  func.func @transform_1(%arg0: i32) -> (i32, i32) {
    %c0_i32 = arith.constant 0 : i32
    %c0_i32_0 = arith.constant 0 : i32
    return %c0_i32, %arg0 : i32, i32
  }
  func.func @transform_2(%arg0: i32) -> (i32, i32) {
    %c0_i32 = arith.constant 0 : i32
    %c0_i32_0 = arith.constant 0 : i32
    %c0_i32_1 = arith.constant 0 : i32
    return %c0_i32, %c0_i32_0 : i32, i32
  }
  func.func @transform_3(%arg0: i32) -> (i32, i32) {
    %c0_i32 = arith.constant 0 : i32
    %c0_i32_0 = arith.constant 0 : i32
    return %c0_i32, %arg0 : i32, i32
  }
  func.func @transform_4(%arg0: i32) -> (i32, i32) {
    %c0_i32 = arith.constant 0 : i32
    %c0_i32_0 = arith.constant 0 : i32
    %c0_i32_1 = arith.constant 0 : i32
    return %c0_i32, %c0_i32_0 : i32, i32
  }
  func.func @transform_5(%arg0: i32) -> (i32, i32) {
    %c0_i32 = arith.constant 0 : i32
    %c0_i32_0 = arith.constant 0 : i32
    return %c0_i32, %arg0 : i32, i32
  }
}

</mosaic_0001>

<bundles_post_ra>
// kernel: pure3d_fwd.4
= control target key start
LH: loop header
LB: loop body
LE: loop exit
PB: predicated region body
PF: predicated region fallthrough
CT: control target
= control target key end

     0   :  { %s1146_s12 = smov 0   ;;  %s1148_s13 = smov 0   ;;  %s1386_s0 = inlined_call_operand.vmem [shape: bf16[4,27], index: 0, kind: input, shape index: {}]   ;;  %s1387_s1 = inlined_call_operand.vmem [shape: bf16[27,4096], index: 1, kind: input, shape index: {}]   ;;  %s1388_s2 = inlined_call_operand.vmem [shape: f32[4,1], index: 2, kind: input, shape index: {}]   ;;  %s1389_s3 = inlined_call_operand.vmem [shape: bf16[4,4096], index: 3, kind: output, shape index: {}]  }
   0x1   :  { %s1150_s14 = smov 0  }
   0x2 LB: > { %s1009_s15 = sadd.s32 4294967295, %s1121_s14   ;;  %s1163_s16 = sadd.s32 1, %s1121_s14   ;;  %s1121_s14 = sphi %s1150_s14, %s1392_s14   ;;  %s1117_s13 = sphi %s1148_s13, %s1391_s13   ;;  %s1113_s12 = sphi %s1146_s12, %s1390_s12  }
   0x3   : > { %s38_s17 = ssub.s32 %s1121_s14, %s1163_s16  ;;  %s41_s18 = sadd.s32 1, %s1117_s13 }
   0x4   : > { %p39_p0 = scmp.eq.s32.totalorder %s38_s17, 0  ;;  %p48_p1 = scmp.ne.s32.totalorder %s1117_s13, %s1113_s12 }
   0x5   : > { %p49_p2 = scmp.eq.s32.totalorder %s1121_s14, 0  ;;  %p1012_p4 = scmp.ge.s32.totalorder %s1121_s14, 2 }
   0x6   : > { %s1172_s19 = scalar_select %p39_p0, %s1117_s13, %s41_s18  }
   0x7   : > { %p50_p3 = por %p49_p2, %p48_p1  ;;  %127 = sbr.rel (%p1012_p4) target bundleno = 34 (0x22), region = 24 }
   0xe   : > { %130 = sbr.rel (!%p50_p3) target bundleno = 34 (0x22), region = 28  ;;  %s132_s20 = sand.u32 (%p50_p3), 1, %s1117_s13  }
   0xf   : > { %s1070_s21 = sshll.u32 (%p50_p3), %s1121_s14, 6  ;;  %s1013_s22 = sshll.u32 (%p50_p3), %s132_s20, 8 }
  0x10   : > { %s1180_s25 = scalar_lea.vmem (%p50_p3), %s1387_s1, %s1070_s21  ;;  %s1185_s26 = scalar_lea.vmem (%p50_p3), [#allocation2], %s1013_s22 }
  0x11   : > { %v150_v0 = vld [vmem:[%s1180_s25] sm:$0xff] (%p50_p3)  ;;  %v152_v1 = vld [vmem:[%s1180_s25 + $0x8] sm:$0xff] (%p50_p3)  ;;  %v154_v2 = vld [vmem:[%s1180_s25 + $0x10] sm:$0xff] (%p50_p3) }
  0x12   : > { %151 = vst [vmem:[%s1185_s26] sm:$0xff] (%p50_p3), %v150_v0  ;;  %153 = vst [vmem:[%s1185_s26 + $0x8] sm:$0xff] (%p50_p3), %v152_v1  ;;  %v156_v3 = vld [vmem:[%s1180_s25 + $0x18] sm:$0xff] (%p50_p3)  ;;  %v158_v4 = vld [vmem:[%s1180_s25 + $0x20] sm:$0xff] (%p50_p3) }
  0x13   : > { %155 = vst [vmem:[%s1185_s26 + $0x10] sm:$0xff] (%p50_p3), %v154_v2  ;;  %v160_v5 = vld [vmem:[%s1180_s25 + $0x28] sm:$0xff] (%p50_p3)  ;;  %157 = vst [vmem:[%s1185_s26 + $0x18] sm:$0xff] (%p50_p3), %v156_v3  ;;  %v162_v6 = vld [vmem:[%s1180_s25 + $0x30] sm:$0xff] (%p50_p3) }
  0x14   : > { %159 = vst [vmem:[%s1185_s26 + $0x20] sm:$0xff] (%p50_p3), %v158_v4  ;;  %161 = vst [vmem:[%s1185_s26 + $0x28] sm:$0xff] (%p50_p3), %v160_v5  ;;  %v164_v7 = vld [vmem:[%s1180_s25 + $0x38] sm:$0xff] (%p50_p3)  ;;  %v166_v8 = vld [vmem:[%s1180_s25 + $0x80] sm:$0xff] (%p50_p3) }
  0x15   : > { %163 = vst [vmem:[%s1185_s26 + $0x30] sm:$0xff] %v162_v6  ;;  %165 = vst [vmem:[%s1185_s26 + $0x38] sm:$0xff] %v164_v7  ;;  %v168_v9 = vld [vmem:[%s1180_s25 + $0x88] sm:$0xff]  ;;  %v170_v10 = vld [vmem:[%s1180_s25 + $0x90] sm:$0xff] }
  0x16   : > { %167 = vst [vmem:[%s1185_s26 + $0x40] sm:$0xff] %v166_v8  ;;  %v172_v11 = vld [vmem:[%s1180_s25 + $0x98] sm:$0xff]  ;;  %169 = vst [vmem:[%s1185_s26 + $0x48] sm:$0xff] %v168_v9  ;;  %v174_v12 = vld [vmem:[%s1180_s25 + $0xa0] sm:$0xff] }
  0x17   : > { %171 = vst [vmem:[%s1185_s26 + $0x50] sm:$0xff] %v170_v10  ;;  %173 = vst [vmem:[%s1185_s26 + $0x58] sm:$0xff] %v172_v11  ;;  %v176_v13 = vld [vmem:[%s1180_s25 + $0xa8] sm:$0xff]  ;;  %v178_v14 = vld [vmem:[%s1180_s25 + $0xb0] sm:$0xff] }
  0x18   : > { %175 = vst [vmem:[%s1185_s26 + $0x60] sm:$0xff] %v174_v12  ;;  %177 = vst [vmem:[%s1185_s26 + $0x68] sm:$0xff] %v176_v13  ;;  %v180_v15 = vld [vmem:[%s1180_s25 + $0xb8] sm:$0xff]  ;;  %v182_v16 = vld [vmem:[%s1180_s25 + $0x100] sm:$0xff] }
  0x19   : > { %179 = vst [vmem:[%s1185_s26 + $0x70] sm:$0xff] %v178_v14  ;;  %v184_v17 = vld [vmem:[%s1180_s25 + $0x108] sm:$0xff]  ;;  %181 = vst [vmem:[%s1185_s26 + $0x78] sm:$0xff] %v180_v15  ;;  %v186_v18 = vld [vmem:[%s1180_s25 + $0x110] sm:$0xff] }
  0x1a   : > { %183 = vst [vmem:[%s1185_s26 + $0x80] sm:$0xff] %v182_v16  ;;  %185 = vst [vmem:[%s1185_s26 + $0x88] sm:$0xff] %v184_v17  ;;  %v188_v19 = vld [vmem:[%s1180_s25 + $0x118] sm:$0xff]  ;;  %v190_v20 = vld [vmem:[%s1180_s25 + $0x120] sm:$0xff] }
  0x1b   : > { %187 = vst [vmem:[%s1185_s26 + $0x90] sm:$0xff] %v186_v18  ;;  %189 = vst [vmem:[%s1185_s26 + $0x98] sm:$0xff] %v188_v19  ;;  %v192_v21 = vld [vmem:[%s1180_s25 + $0x128] sm:$0xff]  ;;  %v194_v22 = vld [vmem:[%s1180_s25 + $0x130] sm:$0xff] }
  0x1c   : > { %191 = vst [vmem:[%s1185_s26 + $0xa0] sm:$0xff] %v190_v20  ;;  %v196_v23 = vld [vmem:[%s1180_s25 + $0x138] sm:$0xff]  ;;  %193 = vst [vmem:[%s1185_s26 + $0xa8] sm:$0xff] %v192_v21  ;;  %v198_v24 = vld [vmem:[%s1180_s25 + $0x180] sm:$0xff] }
  0x1d   : > { %195 = vst [vmem:[%s1185_s26 + $0xb0] sm:$0xff] %v194_v22  ;;  %197 = vst [vmem:[%s1185_s26 + $0xb8] sm:$0xff] %v196_v23  ;;  %v200_v25 = vld [vmem:[%s1180_s25 + $0x188] sm:$0xff]  ;;  %v202_v26 = vld [vmem:[%s1180_s25 + $0x190] sm:$0xff] }
  0x1e   : > { %199 = vst [vmem:[%s1185_s26 + $0xc0] sm:$0xff] %v198_v24  ;;  %201 = vst [vmem:[%s1185_s26 + $0xc8] sm:$0xff] %v200_v25  ;;  %v204_v27 = vld [vmem:[%s1180_s25 + $0x198] sm:$0xff]  ;;  %v206_v28 = vld [vmem:[%s1180_s25 + $0x1a0] sm:$0xff] }
  0x1f   : > { %203 = vst [vmem:[%s1185_s26 + $0xd0] sm:$0xff] %v202_v26  ;;  %v208_v29 = vld [vmem:[%s1180_s25 + $0x1a8] sm:$0xff]  ;;  %205 = vst [vmem:[%s1185_s26 + $0xd8] sm:$0xff] %v204_v27  ;;  %v210_v30 = vld [vmem:[%s1180_s25 + $0x1b0] sm:$0xff] }
  0x20   : > { %207 = vst [vmem:[%s1185_s26 + $0xe0] sm:$0xff] %v206_v28  ;;  %209 = vst [vmem:[%s1185_s26 + $0xe8] sm:$0xff] %v208_v29  ;;  %v212_v31 = vld [vmem:[%s1180_s25 + $0x1b8] sm:$0xff] }
  0x21   : > { %211 = vst [vmem:[%s1185_s26 + $0xf0] sm:$0xff] %v210_v30  ;;  %213 = vst [vmem:[%s1185_s26 + $0xf8] sm:$0xff] %v212_v31 }
  0x22 PF: > { %p1016_p5 = scmp.ge.s32.totalorder %s1121_s14, 1  ;;  %p218_p6 = scmp.lt.s32.totalorder %s1121_s14, 3 }
  0x24   : > { %p219_p7 = pnand %p1016_p5, %p218_p6 }
  0x25   : > { %s225_s27 = sand.u32 (!%p219_p7), 1, %s1113_s12   ;;  %vm443_vm0 = vcmask (!%p219_p7), 1044480   ;;  %vm444_vm1 = vcmask (!%p219_p7), 1045504   ;;  %v1123_v32 = vmov (!%p219_p7), 65535   ;;  %v1124_v34 = vmov (!%p219_p7), 0   ;;  %s1018_s7 = sshll.u32 (!%p219_p7), %s1009_s15, 4 }
  0x26   : > { %222 = sbr.rel (%p219_p7) target bundleno = 301 (0x12d), region = 51  ;;  %s1017_s28 = sshll.u32 (!%p219_p7), %s225_s27, 8  ;;  %v445_v33 = vsel (!%p219_p7), %vm443_vm0, 4294967295, %v1123_v32  ;;  %527 = vmatprep.mubr.bf16.mxu0 (!%p219_p7), %v1124_v34  ;;  %568 = vmatprep.mubr.bf16.mxu1 (!%p219_p7), %v1124_v34  ;;  %v289_v35 = vld [vmem:[%s1388_s2] sm:$0xf] (!%p219_p7)  ;;  %vm439_vm2 = vcmask (!%p219_p7), 220160  }
  0x27   : > { %1098 = vset.pattern.permute.xlu0 (!%p219_p7), %v1124_v34  ;;  %s1257_s4 = scalar_lea.vmem (!%p219_p7), [#allocation2], %s1017_s28  ;;  %v1266_v44 = vsel (!%p219_p7), %vm444_vm1, %v445_v33, 0  ;;  %v1285_v5 = vld [vmem:[%s1386_s0] sm:$0x3] (!%p219_p7)  ;;  %p250_p8 = scmp.lt.s32.totalorder (!%p219_p7), %s1018_s7, 31 }
  0x28   : > { %v257_v36 = vld [vmem:[%s1257_s4] sm:$0xff] (!%p219_p7)  ;;  %v258_v38 = vld [vmem:[%s1257_s4 + $0x8] sm:$0xff] (!%p219_p7)  ;;  %292 = vperm.xlu0 (!%p219_p7), %1098, %v289_v35   ;;  %v259_v51 = vld [vmem:[%s1257_s4 + $0x10] sm:$0xff] (!%p219_p7) }
  0x29   : > { %v265_v37 = vld [vmem:[%s1257_s4 + $0x40] sm:$0xff] (!%p219_p7)  ;;  %v266_v40 = vld [vmem:[%s1257_s4 + $0x48] sm:$0xff] (!%p219_p7)  ;;  %v267_v54 = vld [vmem:[%s1257_s4 + $0x50] sm:$0xff] (!%p219_p7) }
  0x2a   : > { %v1021_v39 = vcombine.high (!%p219_p7), %v257_v36, %v265_v37  ;;  %v1020_v41 = vcombine.low (!%p219_p7), %v257_v36, %v265_v37  ;;  %v273_v42 = vld [vmem:[%s1257_s4 + $0x80] sm:$0xff] (!%p219_p7)  ;;  %v1023_v45 = vcombine.high (!%p219_p7), %v258_v38, %v266_v40  ;;  %v1022_v46 = vcombine.low (!%p219_p7), %v258_v38, %v266_v40  ;;  %v274_v48 = vld [vmem:[%s1257_s4 + $0x88] sm:$0xff] (!%p219_p7)  ;;  %v260_v55 = vld [vmem:[%s1257_s4 + $0x18] sm:$0xff] (!%p219_p7) }
  0x2b   : > { %v281_v43 = vld [vmem:[%s1257_s4 + $0xc0] sm:$0x33] (!%p219_p7)  ;;  %v282_v49 = vld [vmem:[%s1257_s4 + $0xc8] sm:$0x33] (!%p219_p7)  ;;  %v268_v56 = vld [vmem:[%s1257_s4 + $0x58] sm:$0xff] (!%p219_p7)  ;;  %v1025_v0 = vcombine.high (!%p219_p7), %v259_v51, %v267_v54  ;;  %v1024_v6 = vcombine.low (!%p219_p7), %v259_v51, %v267_v54 }
  0x2c   : > { %v1037_v47 = vcombine.high (!%p219_p7), %v273_v42, %v281_v43  ;;  %v1036_v50 = vcombine.low (!%p219_p7), %v273_v42, %v281_v43  ;;  %495 = vmatprep.subr.bf16.mxu0 (!%p219_p7), %v1021_v39  ;;  %v1039_v52 = vcombine.high (!%p219_p7), %v274_v48, %v282_v49  ;;  %v1038_v53 = vcombine.low (!%p219_p7), %v274_v48, %v282_v49  ;;  %v275_v59 = vld [vmem:[%s1257_s4 + $0x90] sm:$0xff] (!%p219_p7)  ;;  %v276_v61 = vld [vmem:[%s1257_s4 + $0x98] sm:$0xff] (!%p219_p7)  ;;  %v261_v11 = vld [vmem:[%s1257_s4 + $0x20] sm:$0xff] (!%p219_p7) }
  0x2d   : > { %536 = vmatprep.subr.bf16.mxu1 %v1023_v45  ;;  %496 = vmatpush1.bf16.msra.mxu0 %v1020_v41  ;;  %v283_v60 = vld [vmem:[%s1257_s4 + $0xd0] sm:$0x33]  ;;  %v284_v1 = vld [vmem:[%s1257_s4 + $0xd8] sm:$0x33]  ;;  %v1027_v2 = vcombine.high %v260_v55, %v268_v56  ;;  %v1026_v8 = vcombine.low %v260_v55, %v268_v56  ;;  %v269_v12 = vld [vmem:[%s1257_s4 + $0x60] sm:$0xff]  ;;  %s1394_s7 = smov (!%p250_p8, %s1018_s7), 31 }
  0x2e   : > { %v451_v57 = vand.u32 %v1037_v47, %v1266_v44  ;;  %v448_v58 = vand.u32 %v1036_v50, %v1266_v44  ;;  %537 = vmatpush1.bf16.msra.mxu1 %v1022_v46  ;;  %v457_v62 = vand.u32 %v1039_v52, %v1266_v44  ;;  %v454_v63 = vand.u32 %v1038_v53, %v1266_v44  ;;  %v262_v14 = vld [vmem:[%s1257_s4 + $0x28] sm:$0xff]  ;;  %v277_v15 = vld [vmem:[%s1257_s4 + $0xa0] sm:$0xff]  ;;  %v263_v31 = vld [vmem:[%s1257_s4 + $0x30] sm:$0xff]  ;;  %s1019_s8 = sshll.u32 %s1394_s7, 1 }
  0x2f   : > { %v1041_v3 = vcombine.high %v275_v59, %v283_v60  ;;  %v1043_v4 = vcombine.high %v276_v61, %v284_v1  ;;  %v1040_v7 = vcombine.low %v275_v59, %v283_v60  ;;  %v1042_v10 = vcombine.low %v276_v61, %v284_v1  ;;  %v285_v16 = vld [vmem:[%s1257_s4 + $0xe0] sm:$0x33]  ;;  %v270_v17 = vld [vmem:[%s1257_s4 + $0x68] sm:$0xff]  ;;  %v271_v32 = vld [vmem:[%s1257_s4 + $0x70] sm:$0xff]  ;;  %s1353_s11 = scalar_lea.vmem %s1389_s3, %s1019_s8 }
  0x30   : > { %497 = vmatprep.subr.bf16.mxu0 %v451_v57  ;;  %538 = vmatprep.subr.bf16.mxu1 %v457_v62  ;;  %v278_v18 = vld [vmem:[%s1257_s4 + $0xa8] sm:$0xff]  ;;  %v1029_v22 = vcombine.high %v261_v11, %v269_v12  ;;  %v1045_v23 = vcombine.high %v277_v15, %v285_v16  ;;  %v1031_v24 = vcombine.high %v262_v14, %v270_v17  ;;  %v264_v35 = vld [vmem:[%s1257_s4 + $0x38] sm:$0xff]  ;;  %v279_v36 = vld [vmem:[%s1257_s4 + $0xb0] sm:$0xff]  ;;  %v1125_v56 = vmov 1983009808  }
  0x31   : > { %498 = vmatpush1.bf16.msra.mxu0 %v448_v58  ;;  %v463_v9 = vand.u32 %v1041_v3, %v1266_v44  ;;  %v469_v13 = vand.u32 %v1043_v4, %v1266_v44  ;;  %v286_v19 = vld [vmem:[%s1257_s4 + $0xe8] sm:$0x33]  ;;  %v460_v20 = vand.u32 %v1040_v7, %v1266_v44  ;;  %v466_v21 = vand.u32 %v1042_v10, %v1266_v44  ;;  %v287_v37 = vld [vmem:[%s1257_s4 + $0xf0] sm:$0x33]  ;;  %v272_v38 = vld [vmem:[%s1257_s4 + $0x78] sm:$0xff] }
  0x32   : > { %539 = vmatpush1.bf16.msra.mxu1 %v454_v63  ;;  %577 = vmatprep.subr.bf16.mxu0 %v1025_v0  ;;  %v1047_v25 = vcombine.high %v278_v18, %v286_v19  ;;  %v1028_v26 = vcombine.low %v261_v11, %v269_v12  ;;  %v1044_v27 = vcombine.low %v277_v15, %v285_v16  ;;  %v280_v39 = vld [vmem:[%s1257_s4 + $0xb8] sm:$0xff]  ;;  %v874_v57 = vunpack.c.l.s4 %v1125_v56 }
  0x33   : > { %618 = vmatprep.subr.bf16.mxu1 %v1027_v2  ;;  %v1030_v28 = vcombine.low %v262_v14, %v270_v17  ;;  %v475_v29 = vand.u32 %v1045_v23, %v1266_v44  ;;  %v1046_v30 = vcombine.low %v278_v18, %v286_v19  ;;  %v288_v40 = vld [vmem:[%s1257_s4 + $0xf8] sm:$0x33]  ;;  %v1033_v43 = vcombine.high %v263_v31, %v271_v32 }
  0x34   : > { %1052 = vmatmul.mubr.msk.bf16.vlgmr.msra.gmra.mrb[0].mxu0 %vm439_vm2, %v1285_v5  ;;  %v481_v33 = vand.u32 %v1047_v25, %v1266_v44  ;;  %v472_v41 = vand.u32 %v1044_v27, %v1266_v44  ;;  %v1049_v45 = vcombine.high %v279_v36, %v287_v37  ;;  %v1035_v46 = vcombine.high %v264_v35, %v272_v38 }
  0x35   : > { %1053 = vmatmul.mubr.msk.bf16.vlgmr.msra.gmra.mrb[0].mxu1 %vm439_vm2, %v1285_v5  ;;  %578 = vmatpush1.bf16.msra.mxu0 %v1024_v6  ;;  %v478_v42 = vand.u32 %v1046_v30, %v1266_v44  ;;  %v1051_v47 = vcombine.high %v280_v39, %v288_v40  ;;  %v1032_v48 = vcombine.low %v263_v31, %v271_v32  ;;  %v876_v58 = vlaneseq }
  0x36   : > { %619 = vmatpush1.bf16.msra.mxu1 %v1026_v8  ;;  %579 = vmatprep.subr.bf16.mxu0 %v463_v9  ;;  %v1048_v49 = vcombine.low %v279_v36, %v287_v37  ;;  %v1034_v50 = vcombine.low %v264_v35, %v272_v38  ;;  %v487_v51 = vand.u32 %v1049_v45, %v1266_v44  ;;  %v875_v60 = vunpack.c.0.s8 %v874_v57 }
  0x37   : > { %620 = vmatprep.subr.bf16.mxu1 %v469_v13  ;;  %609 = vmatprep.mubr.bf16.mxu0 %v1124_v34  ;;  %v1050_v52 = vcombine.low %v280_v39, %v288_v40  ;;  %v493_v53 = vand.u32 %v1051_v47, %v1266_v44  ;;  %v877_v61 = vshrl.u32 %v876_v58, 7 }
  0x38   : > { %650 = vmatprep.mubr.bf16.mxu1 %v1124_v34  ;;  %v484_v54 = vand.u32 %v1048_v49, %v1266_v44 }
  0x39   : > { %580 = vmatpush1.bf16.msra.mxu0 %v460_v20  ;;  %v490_v55 = vand.u32 %v1050_v52, %v1266_v44  ;;  %v1345_v9 = vsub.s32 %v875_v60, %v877_v61 }
  0x3a   : > { %621 = vmatpush1.bf16.msra.mxu1 %v466_v21  ;;  %659 = vmatprep.subr.bf16.mxu0 %v1029_v22 }
  0x3b   : > { %700 = vmatprep.subr.bf16.mxu1 %v1031_v24 }
  0x3c   : > { %1054 = vmatmul.mubr.msk.bf16.vlgmr.msra.gmra.mrb[4].mxu0 %vm439_vm2, %v1285_v5 }
  0x3d   : > { %1055 = vmatmul.mubr.msk.bf16.vlgmr.msra.gmra.mrb[4].mxu1 %vm439_vm2, %v1285_v5  ;;  %660 = vmatpush1.bf16.msra.mxu0 %v1028_v26 }
  0x3e   : > { %701 = vmatpush1.bf16.msra.mxu1 %v1030_v28  ;;  %661 = vmatprep.subr.bf16.mxu0 %v475_v29 }
  0x3f   : > { %702 = vmatprep.subr.bf16.mxu1 %v481_v33  ;;  %691 = vmatprep.mubr.bf16.mxu0 %v1124_v34 }
  0x40   : > { %732 = vmatprep.mubr.bf16.mxu1 %v1124_v34 }
  0x41   : > { %662 = vmatpush1.bf16.msra.mxu0 %v472_v41 }
  0x42   : > { %703 = vmatpush1.bf16.msra.mxu1 %v478_v42  ;;  %741 = vmatprep.subr.bf16.mxu0 %v1033_v43 }
  0x43   : > { %782 = vmatprep.subr.bf16.mxu1 %v1035_v46 }
  0x44   : > { %1056 = vmatmul.mubr.msk.bf16.vlgmr.msra.gmra.mrb[8].mxu0 %vm439_vm2, %v1285_v5 }
  0x45   : > { %1057 = vmatmul.mubr.msk.bf16.vlgmr.msra.gmra.mrb[8].mxu1 %vm439_vm2, %v1285_v5  ;;  %742 = vmatpush1.bf16.msra.mxu0 %v1032_v48 }
  0x46   : > { %783 = vmatpush1.bf16.msra.mxu1 %v1034_v50  ;;  %743 = vmatprep.subr.bf16.mxu0 %v487_v51 }
  0x47   : > { %784 = vmatprep.subr.bf16.mxu1 %v493_v53  ;;  %773 = vmatprep.mubr.bf16.mxu0 %v1124_v34 }
  0x48   : > { %814 = vmatprep.mubr.bf16.mxu1 %v1124_v34 }
  0x49   : > { %744 = vmatpush1.bf16.msra.mxu0 %v484_v54 }
  0x4a   : > { %785 = vmatpush1.bf16.msra.mxu1 %v490_v55 }
  0x4c   : > { %1058 = vmatmul.mubr.msk.bf16.vlgmr.msra.gmra.mrb[12].mxu0 %vm439_vm2, %v1285_v5 }
  0x4d   : > { %1059 = vmatmul.mubr.msk.bf16.vlgmr.msra.gmra.mrb[12].mxu1 %vm439_vm2, %v1285_v5 }
  0xa7   : > { %v1339_v59 = vpop.permute.xlu0 %292 }
 0x107   : > { %v529_v44 = vpop.f32.mrb[0].mxu0 }
 0x108   : > { %v570_v34 = vpop.f32.mrb[0].mxu1  ;;  %v530_v62 = vadd.f32 %v529_v44, %v1339_v59  ;;  %v531_v63 = vpop.f32.mrb[1].mxu0 }
 0x109   : > { %v532_v0 = vadd.f32 %v531_v63, %v1339_v59  ;;  %v571_v1 = vadd.f32 %v570_v34, %v1339_v59  ;;  %v572_v2 = vpop.f32.mrb[1].mxu1  ;;  %v533_v3 = vpop.f32.mrb[2].mxu0 }
 0x10a   : > { %v823_v4 = vmax.f32 %v530_v62, 0.0  ;;  %v573_v5 = vadd.f32 %v572_v2, %v1339_v59  ;;  %v574_v6 = vpop.f32.mrb[2].mxu1  ;;  %v534_v7 = vpop.f32.mrb[3].mxu0 }
 0x10b   : > { %v824_v8 = vmax.f32 %v532_v0, 0.0  ;;  %v825_v10 = vmax.f32 %v571_v1, 0.0  ;;  %v575_v11 = vpop.f32.mrb[3].mxu1 }
 0x10c   : > { %v826_v12 = vmax.f32 %v573_v5, 0.0 }
 0x10d   : > { %v1060_v13 = vpack.c.bf16 %v824_v8, %v823_v4 }
 0x10e   : > { %v1061_v14 = vpack.c.bf16 %v826_v12, %v825_v10 }
 0x10f   : > { %v879_v15 = vrot.slane %v1060_v13, %v1345_v9  ;;  %v611_v16 = vpop.f32.mrb[4].mxu0 }
 0x110   : > { %v886_v17 = vrot.slane %v1061_v14, %v1345_v9  ;;  %v612_v18 = vadd.f32 %v611_v16, %v1339_v59  ;;  %v652_v19 = vpop.f32.mrb[4].mxu1  ;;  %v613_v20 = vpop.f32.mrb[5].mxu0 }
 0x111   : > { %v653_v21 = vadd.f32 %v652_v19, %v1339_v59  ;;  %v614_v22 = vadd.f32 %v613_v20, %v1339_v59  ;;  %v654_v23 = vpop.f32.mrb[5].mxu1  ;;  %v615_v24 = vpop.f32.mrb[6].mxu0 }
 0x112   : > { %v887_v25 = vcombine.low %v879_v15, %v886_v17  ;;  %v827_v26 = vmax.f32 %v612_v18, 0.0  ;;  %v655_v27 = vadd.f32 %v654_v23, %v1339_v59  ;;  %v656_v28 = vpop.f32.mrb[6].mxu1  ;;  %v616_v29 = vpop.f32.mrb[7].mxu0 }
 0x113   : > { %v829_v30 = vmax.f32 %v653_v21, 0.0  ;;  %v828_v31 = vmax.f32 %v614_v22, 0.0  ;;  %v657_v32 = vpop.f32.mrb[7].mxu1 }
 0x114   : > { %943 = vst [vmem:[%s1353_s11] sm:$0xff] %v887_v25  ;;  %v830_v33 = vmax.f32 %v655_v27, 0.0 }
 0x115   : > { %v1062_v35 = vpack.c.bf16 %v828_v31, %v827_v26 }
 0x116   : > { %v1063_v36 = vpack.c.bf16 %v830_v33, %v829_v30 }
 0x117   : > { %v896_v37 = vrot.slane %v1062_v35, %v1345_v9  ;;  %v693_v38 = vpop.f32.mrb[8].mxu0 }
 0x118   : > { %v903_v39 = vrot.slane %v1063_v36, %v1345_v9  ;;  %v694_v40 = vadd.f32 %v693_v38, %v1339_v59  ;;  %v734_v41 = vpop.f32.mrb[8].mxu1  ;;  %v695_v42 = vpop.f32.mrb[9].mxu0 }
 0x119   : > { %v735_v43 = vadd.f32 %v734_v41, %v1339_v59  ;;  %v696_v45 = vadd.f32 %v695_v42, %v1339_v59  ;;  %v736_v46 = vpop.f32.mrb[9].mxu1  ;;  %v697_v47 = vpop.f32.mrb[10].mxu0 }
 0x11a   : > { %v904_v48 = vcombine.low %v896_v37, %v903_v39  ;;  %v831_v49 = vmax.f32 %v694_v40, 0.0  ;;  %v737_v50 = vadd.f32 %v736_v46, %v1339_v59  ;;  %v738_v51 = vpop.f32.mrb[10].mxu1  ;;  %v698_v52 = vpop.f32.mrb[11].mxu0 }
 0x11b   : > { %v833_v53 = vmax.f32 %v735_v43, 0.0  ;;  %v832_v54 = vmax.f32 %v696_v45, 0.0  ;;  %v739_v55 = vpop.f32.mrb[11].mxu1 }
 0x11c   : > { %944 = vst [vmem:[%s1353_s11 + $0x8] sm:$0xff] %v904_v48  ;;  %v834_v56 = vmax.f32 %v737_v50, 0.0 }
 0x11d   : > { %v1064_v57 = vpack.c.bf16 %v832_v54, %v831_v49 }
 0x11e   : > { %v1065_v58 = vpack.c.bf16 %v834_v56, %v833_v53 }
 0x11f   : > { %v913_v44 = vrot.slane %v1064_v57, %v1345_v9  ;;  %v775_v60 = vpop.f32.mrb[12].mxu0 }
 0x120   : > { %v920_v61 = vrot.slane %v1065_v58, %v1345_v9  ;;  %v776_v34 = vadd.f32 %v775_v60, %v1339_v59  ;;  %v816_v62 = vpop.f32.mrb[12].mxu1  ;;  %v777_v63 = vpop.f32.mrb[13].mxu0 }
 0x121   : > { %v817_v0 = vadd.f32 %v816_v62, %v1339_v59  ;;  %v778_v1 = vadd.f32 %v777_v63, %v1339_v59  ;;  %v818_v2 = vpop.f32.mrb[13].mxu1  ;;  %v779_v3 = vpop.f32.mrb[14].mxu0 }
 0x122   : > { %v921_v4 = vcombine.low %v913_v44, %v920_v61  ;;  %v835_v5 = vmax.f32 %v776_v34, 0.0  ;;  %v819_v6 = vadd.f32 %v818_v2, %v1339_v59  ;;  %v820_v7 = vpop.f32.mrb[14].mxu1  ;;  %v780_v8 = vpop.f32.mrb[15].mxu0 }
 0x123   : > { %v837_v10 = vmax.f32 %v817_v0, 0.0  ;;  %v836_v11 = vmax.f32 %v778_v1, 0.0  ;;  %v821_v12 = vpop.f32.mrb[15].mxu1 }
 0x124   : > { %945 = vst [vmem:[%s1353_s11 + $0x10] sm:$0xff] %v921_v4  ;;  %v838_v13 = vmax.f32 %v819_v6, 0.0 }
 0x125   : > { %v1066_v14 = vpack.c.bf16 %v836_v11, %v835_v5 }
 0x126   : > { %v1067_v15 = vpack.c.bf16 %v838_v13, %v837_v10 }
 0x127   : > { %v930_v16 = vrot.slane %v1066_v14, %v1345_v9 }
 0x128   : > { %v937_v17 = vrot.slane %v1067_v15, %v1345_v9 }
 0x12a   : > { %v938_v18 = vcombine.low %v930_v16, %v937_v17 }
 0x12c   : > { %946 = vst [vmem:[%s1353_s11 + $0x18] sm:$0xff] %v938_v18 }
 0x12d PF: > { %p10_p9 = scmp.ge.s32.totalorder %s1163_s16, 4   ;;  %s1390_s12 = smov %s1117_s13 }
 0x12e   : > { %s1391_s13 = smov %s1172_s19  ;;  %s1392_s14 = smov %s1163_s16 }
 0x12f   :  { %12 = sbr.rel (!%p10_p9) target bundleno = 2 (0x2), region = 90 }

// kernel: pure3d_fwd.5
= control target key start
LH: loop header
LB: loop body
LE: loop exit
PB: predicated region body
PF: predicated region fallthrough
CT: control target
= control target key end

     0   :  { %s2476_s18 = smov 0   ;;  %s2478_s19 = smov 0   ;;  %s3039_s0 = inlined_call_operand.vmem [shape: bf16[4,108], index: 0, kind: input, shape index: {}]   ;;  %s3040_s1 = inlined_call_operand.vmem [shape: bf16[108,4096], index: 1, kind: input, shape index: {}]   ;;  %s3041_s2 = inlined_call_operand.vmem [shape: bf16[4,1], index: 2, kind: input, shape index: {}]   ;;  %s3042_s3 = inlined_call_operand.vmem [shape: bf16[1,4096], index: 3, kind: input, shape index: {}]   ;;  %s3043_s4 = inlined_call_operand.vmem [shape: f32[4,1], index: 4, kind: input, shape index: {}]   ;;  %s3044_s5 = inlined_call_operand.vmem [shape: bf16[4,4096], index: 5, kind: output, shape index: {}]  }
   0x1   :  { %s2480_s20 = smov 0  }
   0x2 LB: > { %s2230_s21 = sadd.s32 4294967295, %s2441_s20   ;;  %s2493_s22 = sadd.s32 1, %s2441_s20   ;;  %s2441_s20 = sphi %s2480_s20, %s3047_s20   ;;  %s2437_s19 = sphi %s2478_s19, %s3046_s19   ;;  %s2433_s18 = sphi %s2476_s18, %s3045_s18  }
   0x3   : > { %s40_s23 = ssub.s32 %s2441_s20, %s2493_s22  ;;  %s43_s24 = sadd.s32 1, %s2437_s19 }
   0x4   : > { %p41_p0 = scmp.eq.s32.totalorder %s40_s23, 0  ;;  %p50_p1 = scmp.ne.s32.totalorder %s2437_s19, %s2433_s18 }
   0x5   : > { %p51_p2 = scmp.eq.s32.totalorder %s2441_s20, 0  ;;  %p2233_p4 = scmp.ge.s32.totalorder %s2441_s20, 2 }
   0x6   : > { %s2502_s25 = scalar_select %p41_p0, %s2437_s19, %s43_s24  }
   0x7   : > { %p52_p3 = por %p51_p2, %p50_p1  ;;  %179 = sbr.rel (%p2233_p4) target bundleno = 75 (0x4b), region = 28 }
   0xe   : > { %182 = sbr.rel (!%p52_p3) target bundleno = 75 (0x4b), region = 32  ;;  %s184_s26 = sand.u32 (%p52_p3), 1, %s2437_s19  }
   0xf   : > { %s2386_s27 = sshll.u32 (%p52_p3), %s2441_s20, 6  ;;  %s2387_s28 = smul.u32 (%p52_p3), 896, %s184_s26 }
  0x10   : > { %s2510_s6 = scalar_lea.vmem (%p52_p3), %s3040_s1, %s2386_s27 }
  0x11   : > { %v202_v0 = vld [vmem:[%s2510_s6] sm:$0xff] (%p52_p3)  ;;  %v204_v1 = vld [vmem:[%s2510_s6 + $0x8] sm:$0xff] (%p52_p3)  ;;  %v206_v2 = vld [vmem:[%s2510_s6 + $0x10] sm:$0xff] (%p52_p3)  ;;  %s2518_s7 = scalar_lea.vmem (%p52_p3), [#allocation2], %s2387_s28 }
  0x12   : > { %v208_v3 = vld [vmem:[%s2510_s6 + $0x18] sm:$0xff] (%p52_p3)  ;;  %v210_v4 = vld [vmem:[%s2510_s6 + $0x20] sm:$0xff] (%p52_p3)  ;;  %v212_v5 = vld [vmem:[%s2510_s6 + $0x28] sm:$0xff] (%p52_p3)  ;;  %203 = vst [vmem:[%s2518_s7] sm:$0xff] (%p52_p3), %v202_v0 }
  0x13   : > { %205 = vst [vmem:[%s2518_s7 + $0x8] sm:$0xff] (%p52_p3), %v204_v1  ;;  %207 = vst [vmem:[%s2518_s7 + $0x10] sm:$0xff] (%p52_p3), %v206_v2  ;;  %v214_v6 = vld [vmem:[%s2510_s6 + $0x30] sm:$0xff] (%p52_p3)  ;;  %v216_v7 = vld [vmem:[%s2510_s6 + $0x38] sm:$0xff] (%p52_p3) }
  0x14   : > { %209 = vst [vmem:[%s2518_s7 + $0x18] sm:$0xff] (%p52_p3), %v208_v3  ;;  %211 = vst [vmem:[%s2518_s7 + $0x20] sm:$0xff] (%p52_p3), %v210_v4  ;;  %v218_v8 = vld [vmem:[%s2510_s6 + $0x80] sm:$0xff] (%p52_p3)  ;;  %v220_v9 = vld [vmem:[%s2510_s6 + $0x88] sm:$0xff] (%p52_p3) }
  0x15   : > { %213 = vst [vmem:[%s2518_s7 + $0x28] sm:$0xff] %v212_v5  ;;  %215 = vst [vmem:[%s2518_s7 + $0x30] sm:$0xff] %v214_v6  ;;  %v222_v10 = vld [vmem:[%s2510_s6 + $0x90] sm:$0xff]  ;;  %v224_v11 = vld [vmem:[%s2510_s6 + $0x98] sm:$0xff] }
  0x16   : > { %217 = vst [vmem:[%s2518_s7 + $0x38] sm:$0xff] %v216_v7  ;;  %219 = vst [vmem:[%s2518_s7 + $0x40] sm:$0xff] %v218_v8  ;;  %v226_v12 = vld [vmem:[%s2510_s6 + $0xa0] sm:$0xff]  ;;  %v228_v13 = vld [vmem:[%s2510_s6 + $0xa8] sm:$0xff] }
  0x17   : > { %221 = vst [vmem:[%s2518_s7 + $0x48] sm:$0xff] %v220_v9  ;;  %223 = vst [vmem:[%s2518_s7 + $0x50] sm:$0xff] %v222_v10  ;;  %v230_v14 = vld [vmem:[%s2510_s6 + $0xb0] sm:$0xff]  ;;  %v232_v15 = vld [vmem:[%s2510_s6 + $0xb8] sm:$0xff] }
  0x18   : > { %225 = vst [vmem:[%s2518_s7 + $0x58] sm:$0xff] %v224_v11  ;;  %227 = vst [vmem:[%s2518_s7 + $0x60] sm:$0xff] %v226_v12  ;;  %v234_v16 = vld [vmem:[%s2510_s6 + $0x100] sm:$0xff]  ;;  %v236_v17 = vld [vmem:[%s2510_s6 + $0x108] sm:$0xff] }
  0x19   : > { %229 = vst [vmem:[%s2518_s7 + $0x68] sm:$0xff] %v228_v13  ;;  %231 = vst [vmem:[%s2518_s7 + $0x70] sm:$0xff] %v230_v14  ;;  %v238_v18 = vld [vmem:[%s2510_s6 + $0x110] sm:$0xff]  ;;  %v240_v19 = vld [vmem:[%s2510_s6 + $0x118] sm:$0xff] }
  0x1a   : > { %233 = vst [vmem:[%s2518_s7 + $0x78] sm:$0xff] %v232_v15  ;;  %235 = vst [vmem:[%s2518_s7 + $0x80] sm:$0xff] %v234_v16  ;;  %v242_v20 = vld [vmem:[%s2510_s6 + $0x120] sm:$0xff]  ;;  %v244_v21 = vld [vmem:[%s2510_s6 + $0x128] sm:$0xff] }
  0x1b   : > { %237 = vst [vmem:[%s2518_s7 + $0x88] sm:$0xff] %v236_v17  ;;  %239 = vst [vmem:[%s2518_s7 + $0x90] sm:$0xff] %v238_v18  ;;  %v246_v22 = vld [vmem:[%s2510_s6 + $0x130] sm:$0xff]  ;;  %v248_v23 = vld [vmem:[%s2510_s6 + $0x138] sm:$0xff] }
  0x1c   : > { %241 = vst [vmem:[%s2518_s7 + $0x98] sm:$0xff] %v240_v19  ;;  %243 = vst [vmem:[%s2518_s7 + $0xa0] sm:$0xff] %v242_v20  ;;  %v250_v24 = vld [vmem:[%s2510_s6 + $0x180] sm:$0xff]  ;;  %v252_v25 = vld [vmem:[%s2510_s6 + $0x188] sm:$0xff] }
  0x1d   : > { %245 = vst [vmem:[%s2518_s7 + $0xa8] sm:$0xff] %v244_v21  ;;  %247 = vst [vmem:[%s2518_s7 + $0xb0] sm:$0xff] %v246_v22  ;;  %v254_v26 = vld [vmem:[%s2510_s6 + $0x190] sm:$0xff]  ;;  %v256_v27 = vld [vmem:[%s2510_s6 + $0x198] sm:$0xff] }
  0x1e   : > { %249 = vst [vmem:[%s2518_s7 + $0xb8] sm:$0xff] %v248_v23  ;;  %251 = vst [vmem:[%s2518_s7 + $0xc0] sm:$0xff] %v250_v24  ;;  %v258_v28 = vld [vmem:[%s2510_s6 + $0x1a0] sm:$0xff]  ;;  %v260_v29 = vld [vmem:[%s2510_s6 + $0x1a8] sm:$0xff] }
  0x1f   : > { %253 = vst [vmem:[%s2518_s7 + $0xc8] sm:$0xff] %v252_v25  ;;  %255 = vst [vmem:[%s2518_s7 + $0xd0] sm:$0xff] %v254_v26  ;;  %v262_v30 = vld [vmem:[%s2510_s6 + $0x1b0] sm:$0xff]  ;;  %v264_v31 = vld [vmem:[%s2510_s6 + $0x1b8] sm:$0xff] }
  0x20   : > { %257 = vst [vmem:[%s2518_s7 + $0xd8] sm:$0xff] %v256_v27  ;;  %259 = vst [vmem:[%s2518_s7 + $0xe0] sm:$0xff] %v258_v28  ;;  %v266_v32 = vld [vmem:[%s2510_s6 + $0x200] sm:$0xff]  ;;  %v268_v33 = vld [vmem:[%s2510_s6 + $0x208] sm:$0xff] }
  0x21   : > { %261 = vst [vmem:[%s2518_s7 + $0xe8] sm:$0xff] %v260_v29  ;;  %263 = vst [vmem:[%s2518_s7 + $0xf0] sm:$0xff] %v262_v30  ;;  %v270_v34 = vld [vmem:[%s2510_s6 + $0x210] sm:$0xff]  ;;  %v272_v35 = vld [vmem:[%s2510_s6 + $0x218] sm:$0xff] }
  0x22   : > { %265 = vst [vmem:[%s2518_s7 + $0xf8] sm:$0xff] %v264_v31  ;;  %267 = vst [vmem:[%s2518_s7 + $0x100] sm:$0xff] %v266_v32  ;;  %v274_v36 = vld [vmem:[%s2510_s6 + $0x220] sm:$0xff]  ;;  %v276_v37 = vld [vmem:[%s2510_s6 + $0x228] sm:$0xff] }
  0x23   : > { %269 = vst [vmem:[%s2518_s7 + $0x108] sm:$0xff] %v268_v33  ;;  %271 = vst [vmem:[%s2518_s7 + $0x110] sm:$0xff] %v270_v34  ;;  %v278_v38 = vld [vmem:[%s2510_s6 + $0x230] sm:$0xff]  ;;  %v280_v39 = vld [vmem:[%s2510_s6 + $0x238] sm:$0xff] }
  0x24   : > { %273 = vst [vmem:[%s2518_s7 + $0x118] sm:$0xff] %v272_v35  ;;  %275 = vst [vmem:[%s2518_s7 + $0x120] sm:$0xff] %v274_v36  ;;  %v282_v40 = vld [vmem:[%s2510_s6 + $0x280] sm:$0xff]  ;;  %v284_v41 = vld [vmem:[%s2510_s6 + $0x288] sm:$0xff] }
  0x25   : > { %277 = vst [vmem:[%s2518_s7 + $0x128] sm:$0xff] %v276_v37  ;;  %279 = vst [vmem:[%s2518_s7 + $0x130] sm:$0xff] %v278_v38  ;;  %v286_v42 = vld [vmem:[%s2510_s6 + $0x290] sm:$0xff]  ;;  %v288_v43 = vld [vmem:[%s2510_s6 + $0x298] sm:$0xff] }
  0x26   : > { %281 = vst [vmem:[%s2518_s7 + $0x138] sm:$0xff] %v280_v39  ;;  %283 = vst [vmem:[%s2518_s7 + $0x140] sm:$0xff] %v282_v40  ;;  %v290_v44 = vld [vmem:[%s2510_s6 + $0x2a0] sm:$0xff]  ;;  %v292_v45 = vld [vmem:[%s2510_s6 + $0x2a8] sm:$0xff] }
  0x27   : > { %285 = vst [vmem:[%s2518_s7 + $0x148] sm:$0xff] %v284_v41  ;;  %287 = vst [vmem:[%s2518_s7 + $0x150] sm:$0xff] %v286_v42  ;;  %v294_v46 = vld [vmem:[%s2510_s6 + $0x2b0] sm:$0xff]  ;;  %v296_v47 = vld [vmem:[%s2510_s6 + $0x2b8] sm:$0xff] }
  0x28   : > { %289 = vst [vmem:[%s2518_s7 + $0x158] sm:$0xff] %v288_v43  ;;  %291 = vst [vmem:[%s2518_s7 + $0x160] sm:$0xff] %v290_v44  ;;  %v298_v48 = vld [vmem:[%s2510_s6 + $0x300] sm:$0xff]  ;;  %v300_v49 = vld [vmem:[%s2510_s6 + $0x308] sm:$0xff] }
  0x29   : > { %293 = vst [vmem:[%s2518_s7 + $0x168] sm:$0xff] %v292_v45  ;;  %295 = vst [vmem:[%s2518_s7 + $0x170] sm:$0xff] %v294_v46  ;;  %v302_v50 = vld [vmem:[%s2510_s6 + $0x310] sm:$0xff]  ;;  %v304_v51 = vld [vmem:[%s2510_s6 + $0x318] sm:$0xff] }
  0x2a   : > { %297 = vst [vmem:[%s2518_s7 + $0x178] sm:$0xff] %v296_v47  ;;  %299 = vst [vmem:[%s2518_s7 + $0x180] sm:$0xff] %v298_v48  ;;  %v306_v52 = vld [vmem:[%s2510_s6 + $0x320] sm:$0xff]  ;;  %v308_v53 = vld [vmem:[%s2510_s6 + $0x328] sm:$0xff] }
  0x2b   : > { %301 = vst [vmem:[%s2518_s7 + $0x188] sm:$0xff] %v300_v49  ;;  %303 = vst [vmem:[%s2518_s7 + $0x190] sm:$0xff] %v302_v50  ;;  %v310_v54 = vld [vmem:[%s2510_s6 + $0x330] sm:$0xff]  ;;  %v312_v55 = vld [vmem:[%s2510_s6 + $0x338] sm:$0xff] }
  0x2c   : > { %305 = vst [vmem:[%s2518_s7 + $0x198] sm:$0xff] %v304_v51  ;;  %307 = vst [vmem:[%s2518_s7 + $0x1a0] sm:$0xff] %v306_v52  ;;  %v314_v56 = vld [vmem:[%s2510_s6 + $0x380] sm:$0xff]  ;;  %v316_v57 = vld [vmem:[%s2510_s6 + $0x388] sm:$0xff] }
  0x2d   : > { %309 = vst [vmem:[%s2518_s7 + $0x1a8] sm:$0xff] %v308_v53  ;;  %311 = vst [vmem:[%s2518_s7 + $0x1b0] sm:$0xff] %v310_v54  ;;  %v318_v58 = vld [vmem:[%s2510_s6 + $0x390] sm:$0xff]  ;;  %v320_v59 = vld [vmem:[%s2510_s6 + $0x398] sm:$0xff] }
  0x2e   : > { %313 = vst [vmem:[%s2518_s7 + $0x1b8] sm:$0xff] %v312_v55  ;;  %315 = vst [vmem:[%s2518_s7 + $0x1c0] sm:$0xff] %v314_v56  ;;  %v322_v60 = vld [vmem:[%s2510_s6 + $0x3a0] sm:$0xff]  ;;  %v324_v61 = vld [vmem:[%s2510_s6 + $0x3a8] sm:$0xff] }
  0x2f   : > { %317 = vst [vmem:[%s2518_s7 + $0x1c8] sm:$0xff] %v316_v57  ;;  %319 = vst [vmem:[%s2518_s7 + $0x1d0] sm:$0xff] %v318_v58  ;;  %v326_v62 = vld [vmem:[%s2510_s6 + $0x3b0] sm:$0xff]  ;;  %v328_v63 = vld [vmem:[%s2510_s6 + $0x3b8] sm:$0xff] }
  0x30   : > { %321 = vst [vmem:[%s2518_s7 + $0x1d8] sm:$0xff] %v320_v59  ;;  %323 = vst [vmem:[%s2518_s7 + $0x1e0] sm:$0xff] %v322_v60  ;;  %v330_v0 = vld [vmem:[%s2510_s6 + $0x400] sm:$0xff]  ;;  %v332_v1 = vld [vmem:[%s2510_s6 + $0x408] sm:$0xff] }
  0x31   : > { %325 = vst [vmem:[%s2518_s7 + $0x1e8] sm:$0xff] %v324_v61  ;;  %327 = vst [vmem:[%s2518_s7 + $0x1f0] sm:$0xff] %v326_v62  ;;  %v334_v2 = vld [vmem:[%s2510_s6 + $0x410] sm:$0xff]  ;;  %v336_v3 = vld [vmem:[%s2510_s6 + $0x418] sm:$0xff] }
  0x32   : > { %329 = vst [vmem:[%s2518_s7 + $0x1f8] sm:$0xff] %v328_v63  ;;  %331 = vst [vmem:[%s2518_s7 + $0x200] sm:$0xff] %v330_v0  ;;  %v338_v4 = vld [vmem:[%s2510_s6 + $0x420] sm:$0xff]  ;;  %v340_v5 = vld [vmem:[%s2510_s6 + $0x428] sm:$0xff] }
  0x33   : > { %333 = vst [vmem:[%s2518_s7 + $0x208] sm:$0xff] %v332_v1  ;;  %335 = vst [vmem:[%s2518_s7 + $0x210] sm:$0xff] %v334_v2  ;;  %v342_v6 = vld [vmem:[%s2510_s6 + $0x430] sm:$0xff]  ;;  %v344_v7 = vld [vmem:[%s2510_s6 + $0x438] sm:$0xff] }
  0x34   : > { %337 = vst [vmem:[%s2518_s7 + $0x218] sm:$0xff] %v336_v3  ;;  %339 = vst [vmem:[%s2518_s7 + $0x220] sm:$0xff] %v338_v4  ;;  %v346_v8 = vld [vmem:[%s2510_s6 + $0x480] sm:$0xff]  ;;  %v348_v9 = vld [vmem:[%s2510_s6 + $0x488] sm:$0xff] }
  0x35   : > { %341 = vst [vmem:[%s2518_s7 + $0x228] sm:$0xff] %v340_v5  ;;  %343 = vst [vmem:[%s2518_s7 + $0x230] sm:$0xff] %v342_v6  ;;  %v350_v10 = vld [vmem:[%s2510_s6 + $0x490] sm:$0xff]  ;;  %v352_v11 = vld [vmem:[%s2510_s6 + $0x498] sm:$0xff] }
  0x36   : > { %345 = vst [vmem:[%s2518_s7 + $0x238] sm:$0xff] %v344_v7  ;;  %347 = vst [vmem:[%s2518_s7 + $0x240] sm:$0xff] %v346_v8  ;;  %v354_v12 = vld [vmem:[%s2510_s6 + $0x4a0] sm:$0xff]  ;;  %v356_v13 = vld [vmem:[%s2510_s6 + $0x4a8] sm:$0xff] }
  0x37   : > { %349 = vst [vmem:[%s2518_s7 + $0x248] sm:$0xff] %v348_v9  ;;  %351 = vst [vmem:[%s2518_s7 + $0x250] sm:$0xff] %v350_v10  ;;  %v358_v14 = vld [vmem:[%s2510_s6 + $0x4b0] sm:$0xff]  ;;  %v360_v15 = vld [vmem:[%s2510_s6 + $0x4b8] sm:$0xff] }
  0x38   : > { %353 = vst [vmem:[%s2518_s7 + $0x258] sm:$0xff] %v352_v11  ;;  %355 = vst [vmem:[%s2518_s7 + $0x260] sm:$0xff] %v354_v12  ;;  %v362_v16 = vld [vmem:[%s2510_s6 + $0x500] sm:$0xff]  ;;  %v364_v17 = vld [vmem:[%s2510_s6 + $0x508] sm:$0xff] }
  0x39   : > { %357 = vst [vmem:[%s2518_s7 + $0x268] sm:$0xff] %v356_v13  ;;  %359 = vst [vmem:[%s2518_s7 + $0x270] sm:$0xff] %v358_v14  ;;  %v366_v18 = vld [vmem:[%s2510_s6 + $0x510] sm:$0xff]  ;;  %v368_v19 = vld [vmem:[%s2510_s6 + $0x518] sm:$0xff] }
  0x3a   : > { %361 = vst [vmem:[%s2518_s7 + $0x278] sm:$0xff] %v360_v15  ;;  %363 = vst [vmem:[%s2518_s7 + $0x280] sm:$0xff] %v362_v16  ;;  %v370_v20 = vld [vmem:[%s2510_s6 + $0x520] sm:$0xff]  ;;  %v372_v21 = vld [vmem:[%s2510_s6 + $0x528] sm:$0xff] }
  0x3b   : > { %365 = vst [vmem:[%s2518_s7 + $0x288] sm:$0xff] %v364_v17  ;;  %367 = vst [vmem:[%s2518_s7 + $0x290] sm:$0xff] %v366_v18  ;;  %v374_v22 = vld [vmem:[%s2510_s6 + $0x530] sm:$0xff]  ;;  %v376_v23 = vld [vmem:[%s2510_s6 + $0x538] sm:$0xff] }
  0x3c   : > { %369 = vst [vmem:[%s2518_s7 + $0x298] sm:$0xff] %v368_v19  ;;  %371 = vst [vmem:[%s2518_s7 + $0x2a0] sm:$0xff] %v370_v20  ;;  %v378_v24 = vld [vmem:[%s2510_s6 + $0x580] sm:$0xff]  ;;  %v380_v25 = vld [vmem:[%s2510_s6 + $0x588] sm:$0xff] }
  0x3d   : > { %373 = vst [vmem:[%s2518_s7 + $0x2a8] sm:$0xff] %v372_v21  ;;  %375 = vst [vmem:[%s2518_s7 + $0x2b0] sm:$0xff] %v374_v22  ;;  %v382_v26 = vld [vmem:[%s2510_s6 + $0x590] sm:$0xff]  ;;  %v384_v27 = vld [vmem:[%s2510_s6 + $0x598] sm:$0xff] }
  0x3e   : > { %377 = vst [vmem:[%s2518_s7 + $0x2b8] sm:$0xff] %v376_v23  ;;  %379 = vst [vmem:[%s2518_s7 + $0x2c0] sm:$0xff] %v378_v24  ;;  %v386_v28 = vld [vmem:[%s2510_s6 + $0x5a0] sm:$0xff]  ;;  %v388_v29 = vld [vmem:[%s2510_s6 + $0x5a8] sm:$0xff] }
  0x3f   : > { %381 = vst [vmem:[%s2518_s7 + $0x2c8] sm:$0xff] %v380_v25  ;;  %383 = vst [vmem:[%s2518_s7 + $0x2d0] sm:$0xff] %v382_v26  ;;  %v390_v30 = vld [vmem:[%s2510_s6 + $0x5b0] sm:$0xff]  ;;  %v392_v31 = vld [vmem:[%s2510_s6 + $0x5b8] sm:$0xff] }
  0x40   : > { %385 = vst [vmem:[%s2518_s7 + $0x2d8] sm:$0xff] %v384_v27  ;;  %387 = vst [vmem:[%s2518_s7 + $0x2e0] sm:$0xff] %v386_v28  ;;  %v394_v32 = vld [vmem:[%s2510_s6 + $0x600] sm:$0xff]  ;;  %v396_v33 = vld [vmem:[%s2510_s6 + $0x608] sm:$0xff] }
  0x41   : > { %389 = vst [vmem:[%s2518_s7 + $0x2e8] sm:$0xff] %v388_v29  ;;  %391 = vst [vmem:[%s2518_s7 + $0x2f0] sm:$0xff] %v390_v30  ;;  %v398_v34 = vld [vmem:[%s2510_s6 + $0x610] sm:$0xff]  ;;  %v400_v35 = vld [vmem:[%s2510_s6 + $0x618] sm:$0xff] }
  0x42   : > { %393 = vst [vmem:[%s2518_s7 + $0x2f8] sm:$0xff] %v392_v31  ;;  %395 = vst [vmem:[%s2518_s7 + $0x300] sm:$0xff] %v394_v32  ;;  %v402_v36 = vld [vmem:[%s2510_s6 + $0x620] sm:$0xff]  ;;  %v404_v37 = vld [vmem:[%s2510_s6 + $0x628] sm:$0xff] }
  0x43   : > { %397 = vst [vmem:[%s2518_s7 + $0x308] sm:$0xff] %v396_v33  ;;  %399 = vst [vmem:[%s2518_s7 + $0x310] sm:$0xff] %v398_v34  ;;  %v406_v38 = vld [vmem:[%s2510_s6 + $0x630] sm:$0xff]  ;;  %v408_v39 = vld [vmem:[%s2510_s6 + $0x638] sm:$0xff] }
  0x44   : > { %401 = vst [vmem:[%s2518_s7 + $0x318] sm:$0xff] %v400_v35  ;;  %403 = vst [vmem:[%s2518_s7 + $0x320] sm:$0xff] %v402_v36  ;;  %v410_v40 = vld [vmem:[%s2510_s6 + $0x680] sm:$0xff]  ;;  %v412_v41 = vld [vmem:[%s2510_s6 + $0x688] sm:$0xff] }
  0x45   : > { %405 = vst [vmem:[%s2518_s7 + $0x328] sm:$0xff] %v404_v37  ;;  %407 = vst [vmem:[%s2518_s7 + $0x330] sm:$0xff] %v406_v38  ;;  %v414_v42 = vld [vmem:[%s2510_s6 + $0x690] sm:$0xff]  ;;  %v416_v43 = vld [vmem:[%s2510_s6 + $0x698] sm:$0xff] }
  0x46   : > { %409 = vst [vmem:[%s2518_s7 + $0x338] sm:$0xff] %v408_v39  ;;  %411 = vst [vmem:[%s2518_s7 + $0x340] sm:$0xff] %v410_v40  ;;  %v418_v44 = vld [vmem:[%s2510_s6 + $0x6a0] sm:$0xff]  ;;  %v420_v45 = vld [vmem:[%s2510_s6 + $0x6a8] sm:$0xff] }
  0x47   : > { %413 = vst [vmem:[%s2518_s7 + $0x348] sm:$0xff] %v412_v41  ;;  %415 = vst [vmem:[%s2518_s7 + $0x350] sm:$0xff] %v414_v42  ;;  %v422_v46 = vld [vmem:[%s2510_s6 + $0x6b0] sm:$0xff]  ;;  %v424_v47 = vld [vmem:[%s2510_s6 + $0x6b8] sm:$0xff] }
  0x48   : > { %417 = vst [vmem:[%s2518_s7 + $0x358] sm:$0xff] %v416_v43  ;;  %419 = vst [vmem:[%s2518_s7 + $0x360] sm:$0xff] %v418_v44 }
  0x49   : > { %421 = vst [vmem:[%s2518_s7 + $0x368] sm:$0xff] %v420_v45  ;;  %423 = vst [vmem:[%s2518_s7 + $0x370] sm:$0xff] %v422_v46 }
  0x4a   : > { %425 = vst [vmem:[%s2518_s7 + $0x378] sm:$0xff] %v424_v47 }
  0x4b PF: > { %p2236_p5 = scmp.ge.s32.totalorder %s2441_s20, 1  ;;  %p438_p6 = scmp.lt.s32.totalorder %s2441_s20, 3 }
  0x4d   : > { %p439_p7 = pnand %p2236_p5, %p438_p6 }
  0x4e   : > { %s2237_s8 = sshll.u32 (!%p439_p7), %s2230_s21, 4  ;;  %v611_v48 = vlaneseq (!%p439_p7)  ;;  %v2443_v49 = vmov (!%p439_p7), 1966171168   ;;  %v2444_v51 = vmov (!%p439_p7), 0   ;;  %vm709_vm0 = vcmask (!%p439_p7), 1040384   ;;  %s445_s14 = sand.u32 (!%p439_p7), 1, %s2433_s18  }
  0x4f   : > { %442 = sbr.rel (%p439_p7) target bundleno = 465 (0x1d1), region = 59  ;;  %p478_p8 = scmp.lt.s32.totalorder (!%p439_p7), %s2237_s8, 31  ;;  %v609_v50 = vunpack.c.l.s4 (!%p439_p7), %v2443_v49  ;;  %792 = vmatprep.mubr.bf16.mxu0 (!%p439_p7), %v2444_v51  ;;  %833 = vmatprep.mubr.bf16.mxu1 (!%p439_p7), %v2444_v51  ;;  %v2755_v61 = vsel (!%p439_p7), %vm709_vm0, 65535, %v2444_v51  ;;  %v2765_v18 = vld [vmem:[%s3041_s2] sm:$0x3] (!%p439_p7)  ;;  %vm705_vm1 = vcmask (!%p439_p7), 7168  }
  0x50   : > { %v2744_v52 = vshrl.u32 (!%p439_p7), %v611_v48, 7  ;;  %2416 = vset.pattern.permute.xlu0 (!%p439_p7), %v2444_v51  ;;  %s2388_s15 = smul.u32 (!%p439_p7), 896, %s445_s14  ;;  %vm1636_vm2 = vcmask (!%p439_p7), 1045504   ;;  %vm1632_vm3 = vcmask (!%p439_p7), 883712  }
  0x51   : > { %v610_v53 = vunpack.c.0.s8 (!%p439_p7), %v609_v50 }
  0x52   : > { %s2789_s16 = scalar_lea.vmem (!%p439_p7), [#allocation2], %s2388_s15 }
  0x53   : > { %v613_v54 = vsub.s32 (!%p439_p7), %v610_v53, %v2744_v52  ;;  %v490_v35 = vld [vmem:[%s2789_s16] sm:$0xff] (!%p439_p7)  ;;  %v491_v38 = vld [vmem:[%s2789_s16 + $0x8] sm:$0xff] (!%p439_p7) }
  0x54   : > { %v498_v36 = vld [vmem:[%s2789_s16 + $0x40] sm:$0xff] (!%p439_p7)  ;;  %v499_v39 = vld [vmem:[%s2789_s16 + $0x48] sm:$0xff] (!%p439_p7) }
  0x55   : > { %v2249_v40 = vcombine.high (!%p439_p7), %v490_v35, %v498_v36  ;;  %v2251_v42 = vcombine.high (!%p439_p7), %v491_v38, %v499_v39  ;;  %v506_v43 = vld [vmem:[%s2789_s16 + $0x80] sm:$0xff] (!%p439_p7)  ;;  %v2248_v45 = vcombine.low (!%p439_p7), %v490_v35, %v498_v36  ;;  %v507_v46 = vld [vmem:[%s2789_s16 + $0x88] sm:$0xff] (!%p439_p7)  ;;  %v2250_v49 = vcombine.low (!%p439_p7), %v491_v38, %v499_v39  ;;  %v501_v35 = vld [vmem:[%s2789_s16 + $0x58] sm:$0xff] (!%p439_p7) }
  0x56   : > { %s3049_s8 = smov (!%p478_p8, %s2237_s8), 31  ;;  %v514_v44 = vld [vmem:[%s2789_s16 + $0xc0] sm:$0xff]  ;;  %v515_v47 = vld [vmem:[%s2789_s16 + $0xc8] sm:$0xff]  ;;  %v508_v38 = vld [vmem:[%s2789_s16 + $0x90] sm:$0xff] }
  0x57   : > { %s480_s11 = scalar_lea.vmem %s3042_s3, %s3049_s8  ;;  %v2265_v48 = vcombine.high %v506_v43, %v514_v44  ;;  %v522_v50 = vld [vmem:[%s2789_s16 + $0x100] sm:$0xff]  ;;  %v516_v39 = vld [vmem:[%s2789_s16 + $0xd0] sm:$0xff]  ;;  %s2239_s23 = sshll.u32 %s3049_s8, 1 }
  0x58   : > { %v603_v55 = vld [vmem:[%s480_s11] sm:$0xff]  ;;  %v604_v56 = vld [vmem:[%s480_s11 + $0x8] sm:$0xff]  ;;  %s2996_s27 = scalar_lea.vmem %s3044_s5, %s2239_s23 }
  0x59   : > { %v607_v57 = vcombine.high %v603_v55, %v603_v55  ;;  %v614_v58 = vrot.slane %v603_v55, %v613_v54  ;;  %v663_v59 = vrot.slane %v604_v56, %v613_v54  ;;  %v656_v60 = vcombine.high %v604_v56, %v604_v56  ;;  %v530_v53 = vld [vmem:[%s2789_s16 + $0x140] sm:$0xff]  ;;  %v523_v56 = vld [vmem:[%s2789_s16 + $0x108] sm:$0xff] }
  0x5a   : > { %v2264_v55 = vcombine.low %v506_v43, %v514_v44  ;;  %v509_v44 = vld [vmem:[%s2789_s16 + $0x98] sm:$0xff] }
  0x5b   : > { %v622_v62 = vcombine.high %v614_v58, %v614_v58  ;;  %v630_v63 = vrot.slane %v614_v58, %v613_v54  ;;  %v621_v0 = vrot.slane %v607_v57, %v613_v54  ;;  %v671_v1 = vcombine.high %v663_v59, %v663_v59  ;;  %v531_v57 = vld [vmem:[%s2789_s16 + $0x148] sm:$0xff] }
  0x5c   : > { %v670_v8 = vrot.slane %v656_v60, %v613_v54  ;;  %v679_v24 = vrot.slane %v663_v59, %v613_v54  ;;  %v2281_v58 = vcombine.high %v522_v50, %v530_v53  ;;  %v2266_v59 = vcombine.low %v507_v46, %v515_v47  ;;  %v538_v60 = vld [vmem:[%s2789_s16 + $0x180] sm:$0xff] }
  0x5d   : > { %v644_v2 = vrot.slane %v622_v62, %v613_v54  ;;  %v652_v3 = vcombine.high %v630_v63, %v630_v63  ;;  %v623_v4 = vcombine.high %v621_v0, %v621_v0  ;;  %v713_v5 = vand.u32 %v2755_v61, %v630_v63  ;;  %v2013_v63 = vld [vmem:[%s3043_s4] sm:$0xf] }
  0x5e   : > { %v637_v6 = vrot.slane %v621_v0, %v613_v54  ;;  %v693_v7 = vrot.slane %v671_v1, %v613_v54  ;;  %v672_v20 = vcombine.high %v670_v8, %v670_v8  ;;  %v701_v27 = vcombine.high %v679_v24, %v679_v24  ;;  %v539_v1 = vld [vmem:[%s2789_s16 + $0x188] sm:$0xff]  ;;  %2016 = vperm.xlu0 %2416, %v2013_v63   ;;  %v549_v63 = vld [vmem:[%s2789_s16 + $0x1d8] sm:$0xff] }
  0x5f   : > { %v716_v9 = vand.u32 %v2755_v61, %v644_v2  ;;  %v654_v10 = vcombine.high %v644_v2, %v644_v2  ;;  %v651_v11 = vrot.slane %v623_v4, %v613_v54  ;;  %v719_v12 = vand.u32 %v2755_v61, %v652_v3  ;;  %v547_v2 = vld [vmem:[%s2789_s16 + $0x1c8] sm:$0xff] }
  0x60   : > { %v653_v13 = vcombine.high %v637_v6, %v637_v6  ;;  %v703_v17 = vcombine.high %v693_v7, %v693_v7  ;;  %v725_v19 = vand.u32 %v2755_v61, %v637_v6  ;;  %v740_v22 = vand.u32 %v2755_v61, %v693_v7  ;;  %v562_v6 = vld [vmem:[%s2789_s16 + $0x240] sm:$0xff] }
  0x61   : > { %760 = vmatprep.subr.bf16.mxu0 %v716_v9  ;;  %v722_v14 = vand.u32 %v2755_v61, %v654_v10  ;;  %v728_v15 = vand.u32 %v2755_v61, %v651_v11  ;;  %v655_v16 = vcombine.high %v651_v11, %v651_v11  ;;  %v700_v26 = vrot.slane %v672_v20, %v613_v54  ;;  %v555_v9 = vld [vmem:[%s2789_s16 + $0x208] sm:$0xff] }
  0x62   : > { %761 = vmatpush1.bf16.msra.mxu0 %v713_v5  ;;  %v731_v23 = vand.u32 %v2755_v61, %v653_v13  ;;  %v746_v25 = vand.u32 %v2755_v61, %v703_v17  ;;  %v737_v29 = vand.u32 %v2755_v61, %v679_v24  ;;  %v743_v31 = vand.u32 %v2755_v61, %v701_v27  ;;  %v554_v5 = vld [vmem:[%s2789_s16 + $0x200] sm:$0xff]  ;;  %v563_v10 = vld [vmem:[%s2789_s16 + $0x248] sm:$0xff] }
  0x63   : > { %801 = vmatprep.subr.bf16.mxu1 %v722_v14  ;;  %842 = vmatprep.subr.bf16.mxu0 %v728_v15  ;;  %v734_v21 = vand.u32 %v2755_v61, %v655_v16  ;;  %v704_v28 = vcombine.high %v700_v26, %v700_v26  ;;  %v752_v30 = vand.u32 %v2755_v61, %v700_v26  ;;  %v570_v13 = vld [vmem:[%s2789_s16 + $0x280] sm:$0xff]  ;;  %v571_v17 = vld [vmem:[%s2789_s16 + $0x288] sm:$0xff] }
  0x64   : > { %802 = vmatpush1.bf16.msra.mxu1 %v719_v12  ;;  %v686_v32 = vrot.slane %v670_v8, %v613_v54  ;;  %v2267_v54 = vcombine.high %v507_v46, %v515_v47  ;;  %v2283_v62 = vcombine.high %v523_v56, %v531_v57  ;;  %v2280_v0 = vcombine.low %v522_v50, %v530_v53  ;;  %v578_v14 = vld [vmem:[%s2789_s16 + $0x2c0] sm:$0xff]  ;;  %v595_v26 = vld [vmem:[%s2789_s16 + $0x348] sm:$0x33] }
  0x65   : > { %2240 = vmatmul.mubr.msk.bf16.vlgmr.msra.gmra.mrb[0].mxu0 %vm705_vm1, %v2765_v18  ;;  %883 = vmatprep.subr.bf16.mxu1 %v734_v21  ;;  %v758_v33 = vand.u32 %v2755_v61, %v704_v28  ;;  %v2282_v4 = vcombine.low %v523_v56, %v531_v57  ;;  %v2299_v7 = vcombine.high %v539_v1, %v547_v2  ;;  %v586_v21 = vld [vmem:[%s2789_s16 + $0x300] sm:$0xff] }
  0x66   : > { %843 = vmatpush1.bf16.msra.mxu0 %v725_v19  ;;  %874 = vmatprep.mubr.bf16.mxu0 %v2444_v51  ;;  %v702_v34 = vcombine.high %v686_v32, %v686_v32  ;;  %v749_v37 = vand.u32 %v2755_v61, %v686_v32  ;;  %v2313_v11 = vcombine.high %v554_v5, %v562_v6 }
  0x67   : > { %2241 = vmatmul.mubr.msk.bf16.vlgmr.msra.gmra.mrb[0].mxu1 %vm705_vm1, %v2765_v18  ;;  %924 = vmatprep.subr.bf16.mxu0 %v740_v22  ;;  %v2298_v12 = vcombine.low %v539_v1, %v547_v2  ;;  %v2315_v15 = vcombine.high %v555_v9, %v563_v10  ;;  %v2312_v16 = vcombine.low %v554_v5, %v562_v6  ;;  %v594_v22 = vld [vmem:[%s2789_s16 + $0x340] sm:$0x33]  ;;  %v556_v2 = vld [vmem:[%s2789_s16 + $0x210] sm:$0xff]  ;;  %v557_v6 = vld [vmem:[%s2789_s16 + $0x218] sm:$0xff] }
  0x68   : > { %884 = vmatpush1.bf16.msra.mxu1 %v731_v23  ;;  %915 = vmatprep.mubr.bf16.mxu1 %v2444_v51  ;;  %v755_v41 = vand.u32 %v2755_v61, %v702_v34  ;;  %v546_v61 = vld [vmem:[%s2789_s16 + $0x1c0] sm:$0xff]  ;;  %v2329_v19 = vcombine.high %v570_v13, %v578_v14  ;;  %v2314_v20 = vcombine.low %v555_v9, %v563_v10  ;;  %v493_v34 = vld [vmem:[%s2789_s16 + $0x18] sm:$0xff]  ;;  %v572_v10 = vld [vmem:[%s2789_s16 + $0x290] sm:$0xff] }
  0x69   : > { %965 = vmatprep.subr.bf16.mxu1 %v746_v25  ;;  %v2297_v3 = vcombine.high %v538_v60, %v546_v61  ;;  %v2296_v8 = vcombine.low %v538_v60, %v546_v61  ;;  %v2328_v24 = vcombine.low %v570_v13, %v578_v14  ;;  %v587_v25 = vld [vmem:[%s2789_s16 + $0x308] sm:$0xff]  ;;  %v2345_v27 = vcombine.high %v586_v21, %v594_v22  ;;  %v573_v14 = vld [vmem:[%s2789_s16 + $0x298] sm:$0xff] }
  0x6a   : > { %v2344_v28 = vcombine.low %v586_v21, %v594_v22  ;;  %v2347_v32 = vcombine.high %v587_v25, %v595_v26  ;;  %v2269_v46 = vcombine.high %v508_v38, %v516_v39  ;;  %v2254_v47 = vcombine.low %v493_v34, %v501_v35  ;;  %v589_v22 = vld [vmem:[%s2789_s16 + $0x318] sm:$0xff] }
  0x6b   : > { %v2268_v53 = vcombine.low %v508_v38, %v516_v39 }
  0x6c   : > { %v1638_v36 = vsel %vm1636_vm2, %v2344_v28, 0  ;;  %v502_v28 = vld [vmem:[%s2789_s16 + $0x60] sm:$0xff] }
  0x6d   : > { %2242 = vmatmul.mubr.msk.bf16.vlgmr.msra.gmra.mrb[4].mxu0 %vm705_vm1, %v2765_v18 }
  0x6e   : > { %925 = vmatpush1.bf16.msra.mxu0 %v737_v29  ;;  %956 = vmatprep.mubr.bf16.mxu0 %v2444_v51 }
  0x6f   : > { %2243 = vmatmul.mubr.msk.bf16.vlgmr.msra.gmra.mrb[4].mxu1 %vm705_vm1, %v2765_v18  ;;  %1006 = vmatprep.subr.bf16.mxu0 %v752_v30  ;;  %v492_v30 = vld [vmem:[%s2789_s16 + $0x10] sm:$0xff] }
  0x70   : > { %966 = vmatpush1.bf16.msra.mxu1 %v743_v31  ;;  %997 = vmatprep.mubr.bf16.mxu1 %v2444_v51  ;;  %v500_v31 = vld [vmem:[%s2789_s16 + $0x50] sm:$0xff] }
  0x71   : > { %1047 = vmatprep.subr.bf16.mxu1 %v758_v33  ;;  %v2346_v33 = vcombine.low %v587_v25, %v595_v26  ;;  %v2252_v43 = vcombine.low %v492_v30, %v500_v31 }
  0x75   : > { %2244 = vmatmul.mubr.msk.bf16.vlgmr.msra.gmra.mrb[8].mxu0 %vm705_vm1, %v2765_v18 }
  0x76   : > { %1007 = vmatpush1.bf16.msra.mxu0 %v749_v37  ;;  %1038 = vmatprep.mubr.bf16.mxu0 %v2444_v51  ;;  %v2253_v37 = vcombine.high %v492_v30, %v500_v31  ;;  %v495_v31 = vld [vmem:[%s2789_s16 + $0x28] sm:$0xff] }
  0x77   : > { %2245 = vmatmul.mubr.msk.bf16.vlgmr.msra.gmra.mrb[8].mxu1 %vm705_vm1, %v2765_v18  ;;  %1685 = vmatprep.subr.bf16.mxu0 %v2249_v40  ;;  %v1644_v40 = vsel %vm1636_vm2, %v2346_v33, 0 }
  0x78   : > { %1048 = vmatpush1.bf16.msra.mxu1 %v755_v41  ;;  %1079 = vmatprep.mubr.bf16.mxu1 %v2444_v51  ;;  %v2255_v41 = vcombine.high %v493_v34, %v501_v35  ;;  %v510_v35 = vld [vmem:[%s2789_s16 + $0xa0] sm:$0xff] }
  0x79   : > { %1726 = vmatprep.subr.bf16.mxu1 %v2251_v42  ;;  %v2849_v42 = vld [vmem:[%s3039_s0] sm:$0x3] }
  0x7d   : > { %2246 = vmatmul.mubr.msk.bf16.vlgmr.msra.gmra.mrb[12].mxu0 %vm705_vm1, %v2765_v18 }
  0x7e   : > { %1686 = vmatpush1.bf16.msra.mxu0 %v2248_v45  ;;  %1717 = vmatprep.mubr.bf16.mxu0 %v2444_v51  ;;  %v517_v45 = vld [vmem:[%s2789_s16 + $0xd8] sm:$0xff] }
  0x7f   : > { %2247 = vmatmul.mubr.msk.bf16.vlgmr.msra.gmra.mrb[12].mxu1 %vm705_vm1, %v2765_v18  ;;  %1687 = vmatprep.subr.bf16.mxu0 %v2265_v48  ;;  %v579_v18 = vld [vmem:[%s2789_s16 + $0x2c8] sm:$0xff]  ;;  %v524_v48 = vld [vmem:[%s2789_s16 + $0x110] sm:$0xff]  ;;  %v2271_v50 = vcombine.high %v509_v44, %v517_v45  ;;  %v2270_v57 = vcombine.low %v509_v44, %v517_v45  ;;  %v526_v45 = vld [vmem:[%s2789_s16 + $0x120] sm:$0xff] }
  0x80   : > { %1727 = vmatpush1.bf16.msra.mxu1 %v2250_v49  ;;  %1758 = vmatprep.mubr.bf16.mxu1 %v2444_v51  ;;  %v2331_v23 = vcombine.high %v571_v17, %v579_v18  ;;  %v2330_v29 = vcombine.low %v571_v17, %v579_v18  ;;  %v532_v49 = vld [vmem:[%s2789_s16 + $0x150] sm:$0xff] }
  0x81   : > { %1728 = vmatprep.subr.bf16.mxu1 %v2267_v54  ;;  %v525_v54 = vld [vmem:[%s2789_s16 + $0x118] sm:$0xff]  ;;  %v2285_v56 = vcombine.high %v524_v48, %v532_v49  ;;  %v2284_v61 = vcombine.low %v524_v48, %v532_v49  ;;  %v588_v18 = vld [vmem:[%s2789_s16 + $0x310] sm:$0xff]  ;;  %v527_v49 = vld [vmem:[%s2789_s16 + $0x128] sm:$0xff] }
  0x82   : > { %1688 = vmatpush1.bf16.msra.mxu0 %v2264_v55  ;;  %v533_v55 = vld [vmem:[%s2789_s16 + $0x158] sm:$0xff] }
  0x83   : > { %1689 = vmatprep.subr.bf16.mxu0 %v2281_v58  ;;  %v540_v58 = vld [vmem:[%s2789_s16 + $0x190] sm:$0xff]  ;;  %v2287_v60 = vcombine.high %v525_v54, %v533_v55  ;;  %v2286_v1 = vcombine.low %v525_v54, %v533_v55  ;;  %v542_v55 = vld [vmem:[%s2789_s16 + $0x1a0] sm:$0xff] }
  0x84   : > { %1729 = vmatpush1.bf16.msra.mxu1 %v2266_v59  ;;  %v548_v59 = vld [vmem:[%s2789_s16 + $0x1d0] sm:$0xff] }
  0x85   : > { %1730 = vmatprep.subr.bf16.mxu1 %v2283_v62  ;;  %v541_v62 = vld [vmem:[%s2789_s16 + $0x198] sm:$0xff]  ;;  %v2300_v5 = vcombine.low %v540_v58, %v548_v59 }
  0x86   : > { %1690 = vmatpush1.bf16.msra.mxu0 %v2280_v0  ;;  %v2301_v0 = vcombine.high %v540_v58, %v548_v59  ;;  %v2302_v9 = vcombine.low %v541_v62, %v549_v63  ;;  %v543_v59 = vld [vmem:[%s2789_s16 + $0x1a8] sm:$0xff] }
  0x87   : > { %1691 = vmatprep.subr.bf16.mxu0 %v2297_v3  ;;  %v564_v3 = vld [vmem:[%s2789_s16 + $0x250] sm:$0xff] }
  0x88   : > { %1731 = vmatpush1.bf16.msra.mxu1 %v2282_v4  ;;  %v2303_v4 = vcombine.high %v541_v62, %v549_v63  ;;  %v2316_v13 = vcombine.low %v556_v2, %v564_v3  ;;  %v558_v63 = vld [vmem:[%s2789_s16 + $0x220] sm:$0xff] }
  0x89   : > { %1732 = vmatprep.subr.bf16.mxu1 %v2299_v7  ;;  %v565_v7 = vld [vmem:[%s2789_s16 + $0x258] sm:$0xff] }
  0x8a   : > { %1692 = vmatpush1.bf16.msra.mxu0 %v2296_v8  ;;  %v2317_v8 = vcombine.high %v556_v2, %v564_v3  ;;  %v2318_v17 = vcombine.low %v557_v6, %v565_v7  ;;  %v559_v3 = vld [vmem:[%s2789_s16 + $0x228] sm:$0xff] }
  0x8b   : > { %1693 = vmatprep.subr.bf16.mxu0 %v2313_v11  ;;  %v580_v11 = vld [vmem:[%s2789_s16 + $0x2d0] sm:$0xff] }
  0x8c   : > { %1733 = vmatpush1.bf16.msra.mxu1 %v2298_v12  ;;  %v2319_v12 = vcombine.high %v557_v6, %v565_v7  ;;  %v2332_v21 = vcombine.low %v572_v10, %v580_v11  ;;  %v574_v7 = vld [vmem:[%s2789_s16 + $0x2a0] sm:$0xff] }
  0x8d   : > { %1734 = vmatprep.subr.bf16.mxu1 %v2315_v15  ;;  %v581_v15 = vld [vmem:[%s2789_s16 + $0x2d8] sm:$0xff] }
  0x8e   : > { %1694 = vmatpush1.bf16.msra.mxu0 %v2312_v16  ;;  %v2333_v16 = vcombine.high %v572_v10, %v580_v11  ;;  %v2334_v26 = vcombine.low %v573_v14, %v581_v15  ;;  %v575_v11 = vld [vmem:[%s2789_s16 + $0x2a8] sm:$0xff] }
  0x8f   : > { %1695 = vmatprep.subr.bf16.mxu0 %v2329_v19  ;;  %v596_v19 = vld [vmem:[%s2789_s16 + $0x350] sm:$0x33] }
  0x90   : > { %1735 = vmatpush1.bf16.msra.mxu1 %v2314_v20  ;;  %v2335_v20 = vcombine.high %v573_v14, %v581_v15  ;;  %v2348_v25 = vcombine.low %v588_v18, %v596_v19  ;;  %v590_v15 = vld [vmem:[%s2789_s16 + $0x320] sm:$0xff] }
  0x91   : > { %1736 = vmatprep.subr.bf16.mxu1 %v2331_v23  ;;  %v597_v23 = vld [vmem:[%s2789_s16 + $0x358] sm:$0x33] }
  0x92   : > { %1696 = vmatpush1.bf16.msra.mxu0 %v2328_v24  ;;  %v2349_v24 = vcombine.high %v588_v18, %v596_v19  ;;  %v2350_v30 = vcombine.low %v589_v22, %v597_v23  ;;  %v1650_v33 = vsel %vm1636_vm2, %v2348_v25, 0  ;;  %v591_v19 = vld [vmem:[%s2789_s16 + $0x328] sm:$0xff]  ;;  %v504_v25 = vld [vmem:[%s2789_s16 + $0x70] sm:$0xff] }
  0x93   : > { %2360 = vmatprep.subr.msk.bf16.mxu0 %vm1636_vm2, %v2345_v27  ;;  %v494_v27 = vld [vmem:[%s2789_s16 + $0x20] sm:$0xff] }
  0x94   : > { %1737 = vmatpush1.bf16.msra.mxu1 %v2330_v29  ;;  %v2351_v29 = vcombine.high %v589_v22, %v597_v23  ;;  %v2257_v34 = vcombine.high %v494_v27, %v502_v28  ;;  %v2256_v39 = vcombine.low %v494_v27, %v502_v28  ;;  %v497_v28 = vld [vmem:[%s2789_s16 + $0x38] sm:$0xff] }
  0x95   : > { %2362 = vmatprep.subr.msk.bf16.mxu1 %vm1636_vm2, %v2347_v32  ;;  %v503_v32 = vld [vmem:[%s2789_s16 + $0x68] sm:$0xff] }
  0x96   : > { %1698 = vmatpush1.bf16.msra.mxu0 %v1638_v36  ;;  %v518_v36 = vld [vmem:[%s2789_s16 + $0xe0] sm:$0xff]  ;;  %v2259_v38 = vcombine.high %v495_v31, %v503_v32  ;;  %v2258_v44 = vcombine.low %v495_v31, %v503_v32  ;;  %v512_v32 = vld [vmem:[%s2789_s16 + $0xb0] sm:$0xff] }
  0x97   : > { %1767 = vmatprep.subr.bf16.mxu0 %v2253_v37  ;;  %v1656_v37 = vsel %vm1636_vm2, %v2350_v30, 0  ;;  %v2272_v48 = vcombine.low %v510_v35, %v518_v36 }
  0x98   : > { %1739 = vmatpush1.bf16.msra.mxu1 %v1644_v40  ;;  %v511_v40 = vld [vmem:[%s2789_s16 + $0xa8] sm:$0xff] }
  0x99   : > { %2361 = vmatmul.mubr.msk.bf16.vlgmr.msra.gmra.mrb[16].mxu0 %vm1632_vm3, %v2849_v42  ;;  %1808 = vmatprep.subr.bf16.mxu1 %v2255_v41  ;;  %v519_v41 = vld [vmem:[%s2789_s16 + $0xe8] sm:$0xff] }
  0x9a   : > { %1768 = vmatpush1.bf16.msra.mxu0 %v2252_v43  ;;  %1799 = vmatprep.mubr.bf16.mxu0 %v2444_v51  ;;  %v2273_v43 = vcombine.high %v510_v35, %v518_v36  ;;  %v2274_v54 = vcombine.low %v511_v40, %v519_v41 }
  0x9b   : > { %2363 = vmatmul.mubr.msk.bf16.vlgmr.msra.gmra.mrb[16].mxu1 %vm1632_vm3, %v2849_v42  ;;  %1769 = vmatprep.subr.bf16.mxu0 %v2269_v46  ;;  %v534_v46 = vld [vmem:[%s2789_s16 + $0x160] sm:$0xff] }
  0x9c   : > { %1809 = vmatpush1.bf16.msra.mxu1 %v2254_v47  ;;  %1840 = vmatprep.mubr.bf16.mxu1 %v2444_v51  ;;  %v2275_v47 = vcombine.high %v511_v40, %v519_v41  ;;  %v2288_v58 = vcombine.low %v526_v45, %v534_v46  ;;  %v528_v41 = vld [vmem:[%s2789_s16 + $0x130] sm:$0xff] }
  0x9d   : > { %1810 = vmatprep.subr.bf16.mxu1 %v2271_v50  ;;  %v535_v50 = vld [vmem:[%s2789_s16 + $0x168] sm:$0xff] }
  0x9e   : > { %1770 = vmatpush1.bf16.msra.mxu0 %v2268_v53  ;;  %v2289_v53 = vcombine.high %v526_v45, %v534_v46  ;;  %v2290_v62 = vcombine.low %v527_v49, %v535_v50  ;;  %v529_v46 = vld [vmem:[%s2789_s16 + $0x138] sm:$0xff] }
  0x9f   : > { %1771 = vmatprep.subr.bf16.mxu0 %v2285_v56  ;;  %v550_v56 = vld [vmem:[%s2789_s16 + $0x1e0] sm:$0xff] }
  0xa0   : > { %1811 = vmatpush1.bf16.msra.mxu1 %v2270_v57  ;;  %v2291_v57 = vcombine.high %v527_v49, %v535_v50  ;;  %v2304_v2 = vcombine.low %v542_v55, %v550_v56  ;;  %v544_v50 = vld [vmem:[%s2789_s16 + $0x1b0] sm:$0xff] }
  0xa1   : > { %1812 = vmatprep.subr.bf16.mxu1 %v2287_v60  ;;  %v551_v60 = vld [vmem:[%s2789_s16 + $0x1e8] sm:$0xff] }
  0xa2   : > { %1772 = vmatpush1.bf16.msra.mxu0 %v2284_v61  ;;  %v2305_v61 = vcombine.high %v542_v55, %v550_v56  ;;  %v2306_v6 = vcombine.low %v543_v59, %v551_v60  ;;  %v545_v56 = vld [vmem:[%s2789_s16 + $0x1b8] sm:$0xff] }
  0xa3   : > { %1773 = vmatprep.subr.bf16.mxu0 %v2301_v0  ;;  %v566_v0 = vld [vmem:[%s2789_s16 + $0x260] sm:$0xff] }
  0xa4   : > { %1813 = vmatpush1.bf16.msra.mxu1 %v2286_v1  ;;  %v2307_v1 = vcombine.high %v543_v59, %v551_v60  ;;  %v2320_v10 = vcombine.low %v558_v63, %v566_v0  ;;  %v560_v60 = vld [vmem:[%s2789_s16 + $0x230] sm:$0xff] }
  0xa5   : > { %1814 = vmatprep.subr.bf16.mxu1 %v2303_v4  ;;  %v567_v4 = vld [vmem:[%s2789_s16 + $0x268] sm:$0xff] }
  0xa6   : > { %1774 = vmatpush1.bf16.msra.mxu0 %v2300_v5  ;;  %v2321_v5 = vcombine.high %v558_v63, %v566_v0  ;;  %v2322_v14 = vcombine.low %v559_v3, %v567_v4  ;;  %v561_v63 = vld [vmem:[%s2789_s16 + $0x238] sm:$0xff] }
  0xa7   : > { %1775 = vmatprep.subr.bf16.mxu0 %v2317_v8  ;;  %v582_v8 = vld [vmem:[%s2789_s16 + $0x2e0] sm:$0xff]  ;;  %v569_v0 = vld [vmem:[%s2789_s16 + $0x278] sm:$0xff] }
  0xa8   : > { %1815 = vmatpush1.bf16.msra.mxu1 %v2302_v9  ;;  %v2323_v9 = vcombine.high %v559_v3, %v567_v4  ;;  %v2336_v18 = vcombine.low %v574_v7, %v582_v8  ;;  %v576_v3 = vld [vmem:[%s2789_s16 + $0x2b0] sm:$0xff] }
  0xa9   : > { %1816 = vmatprep.subr.bf16.mxu1 %v2319_v12  ;;  %v583_v12 = vld [vmem:[%s2789_s16 + $0x2e8] sm:$0xff]  ;;  %v584_v4 = vld [vmem:[%s2789_s16 + $0x2f0] sm:$0xff] }
  0xaa   : > { %1776 = vmatpush1.bf16.msra.mxu0 %v2316_v13  ;;  %v2337_v13 = vcombine.high %v574_v7, %v582_v8  ;;  %v2338_v23 = vcombine.low %v575_v11, %v583_v12  ;;  %v577_v7 = vld [vmem:[%s2789_s16 + $0x2b8] sm:$0xff] }
  0xab   : > { %1777 = vmatprep.subr.bf16.mxu0 %v2333_v16  ;;  %v598_v16 = vld [vmem:[%s2789_s16 + $0x360] sm:$0x33]  ;;  %v585_v8 = vld [vmem:[%s2789_s16 + $0x2f8] sm:$0xff] }
  0xac   : > { %1817 = vmatpush1.bf16.msra.mxu1 %v2318_v17  ;;  %v2339_v17 = vcombine.high %v575_v11, %v583_v12  ;;  %v2352_v22 = vcombine.low %v590_v15, %v598_v16  ;;  %v592_v11 = vld [vmem:[%s2789_s16 + $0x330] sm:$0xff] }
  0xad   : > { %1818 = vmatprep.subr.bf16.mxu1 %v2335_v20  ;;  %v599_v20 = vld [vmem:[%s2789_s16 + $0x368] sm:$0x33]  ;;  %v600_v12 = vld [vmem:[%s2789_s16 + $0x370] sm:$0x33] }
  0xae   : > { %1778 = vmatpush1.bf16.msra.mxu0 %v2332_v21  ;;  %v2353_v21 = vcombine.high %v590_v15, %v598_v16  ;;  %v2354_v27 = vcombine.low %v591_v19, %v599_v20  ;;  %v1662_v30 = vsel %vm1636_vm2, %v2352_v22, 0  ;;  %v593_v15 = vld [vmem:[%s2789_s16 + $0x338] sm:$0xff] }
  0xaf   : > { %2364 = vmatprep.subr.msk.bf16.mxu0 %vm1636_vm2, %v2349_v24  ;;  %v496_v24 = vld [vmem:[%s2789_s16 + $0x30] sm:$0xff]  ;;  %v601_v16 = vld [vmem:[%s2789_s16 + $0x378] sm:$0x33] }
  0xb0   : > { %1819 = vmatpush1.bf16.msra.mxu1 %v2334_v26  ;;  %v2355_v26 = vcombine.high %v591_v19, %v599_v20  ;;  %v2261_v31 = vcombine.high %v496_v24, %v504_v25  ;;  %v2260_v36 = vcombine.low %v496_v24, %v504_v25  ;;  %v2342_v19 = vcombine.low %v577_v7, %v585_v8 }
  0xb1   : > { %2366 = vmatprep.subr.msk.bf16.mxu1 %vm1636_vm2, %v2351_v29  ;;  %v505_v29 = vld [vmem:[%s2789_s16 + $0x78] sm:$0xff]  ;;  %v2359_v20 = vcombine.high %v593_v15, %v601_v16 }
  0xb2   : > { %1780 = vmatpush1.bf16.msra.mxu0 %v1650_v33  ;;  %v520_v33 = vld [vmem:[%s2789_s16 + $0xf0] sm:$0xff]  ;;  %v2263_v35 = vcombine.high %v497_v28, %v505_v29  ;;  %v2262_v40 = vcombine.low %v497_v28, %v505_v29 }
  0xb3   : > { %1849 = vmatprep.subr.bf16.mxu0 %v2257_v34  ;;  %v1668_v34 = vsel %vm1636_vm2, %v2354_v27, 0  ;;  %v2276_v45 = vcombine.low %v512_v32, %v520_v33 }
  0xb4   : > { %1821 = vmatpush1.bf16.msra.mxu1 %v1656_v37  ;;  %v513_v37 = vld [vmem:[%s2789_s16 + $0xb8] sm:$0xff] }
  0xb5   : > { %2365 = vmatmul.mubr.msk.bf16.vlgmr.msra.gmra.mrb[20].mxu0 %vm1632_vm3, %v2849_v42  ;;  %1890 = vmatprep.subr.bf16.mxu1 %v2259_v38  ;;  %v521_v38 = vld [vmem:[%s2789_s16 + $0xf8] sm:$0xff] }
  0xb6   : > { %1850 = vmatpush1.bf16.msra.mxu0 %v2256_v39  ;;  %1881 = vmatprep.mubr.bf16.mxu0 %v2444_v51  ;;  %v2277_v39 = vcombine.high %v512_v32, %v520_v33  ;;  %v2278_v49 = vcombine.low %v513_v37, %v521_v38 }
  0xb7   : > { %2367 = vmatmul.mubr.msk.bf16.vlgmr.msra.gmra.mrb[20].mxu1 %vm1632_vm3, %v2849_v42  ;;  %1851 = vmatprep.subr.bf16.mxu0 %v2273_v43  ;;  %v536_v43 = vld [vmem:[%s2789_s16 + $0x170] sm:$0xff] }
  0xb8   : > { %1891 = vmatpush1.bf16.msra.mxu1 %v2258_v44  ;;  %1922 = vmatprep.mubr.bf16.mxu1 %v2444_v51  ;;  %v2279_v44 = vcombine.high %v513_v37, %v521_v38  ;;  %v2292_v55 = vcombine.low %v528_v41, %v536_v43 }
  0xb9   : > { %1892 = vmatprep.subr.bf16.mxu1 %v2275_v47  ;;  %v537_v47 = vld [vmem:[%s2789_s16 + $0x178] sm:$0xff] }
  0xba   : > { %1852 = vmatpush1.bf16.msra.mxu0 %v2272_v48  ;;  %v2293_v48 = vcombine.high %v528_v41, %v536_v43  ;;  %v2294_v59 = vcombine.low %v529_v46, %v537_v47 }
  0xbb   : > { %1853 = vmatprep.subr.bf16.mxu0 %v2289_v53  ;;  %v552_v53 = vld [vmem:[%s2789_s16 + $0x1f0] sm:$0xff] }
  0xbc   : > { %1893 = vmatpush1.bf16.msra.mxu1 %v2274_v54  ;;  %v2295_v54 = vcombine.high %v529_v46, %v537_v47 }
  0xbd   : > { %1894 = vmatprep.subr.bf16.mxu1 %v2291_v57  ;;  %v553_v57 = vld [vmem:[%s2789_s16 + $0x1f8] sm:$0xff] }
  0xbe   : > { %1854 = vmatpush1.bf16.msra.mxu0 %v2288_v58  ;;  %v2309_v58 = vcombine.high %v544_v50, %v552_v53 }
  0xbf   : > { %1855 = vmatprep.subr.bf16.mxu0 %v2305_v61  ;;  %v568_v61 = vld [vmem:[%s2789_s16 + $0x270] sm:$0xff] }
  0xc0   : > { %1895 = vmatpush1.bf16.msra.mxu1 %v2290_v62  ;;  %v2311_v62 = vcombine.high %v545_v56, %v553_v57 }
  0xc1   : > { %1896 = vmatprep.subr.bf16.mxu1 %v2307_v1  ;;  %v2325_v1 = vcombine.high %v560_v60, %v568_v61 }
  0xc2   : > { %1856 = vmatpush1.bf16.msra.mxu0 %v2304_v2  ;;  %v2310_v2 = vcombine.low %v545_v56, %v553_v57 }
  0xc3   : > { %1857 = vmatprep.subr.bf16.mxu0 %v2321_v5  ;;  %v2327_v5 = vcombine.high %v561_v63, %v569_v0 }
  0xc4   : > { %1897 = vmatpush1.bf16.msra.mxu1 %v2306_v6  ;;  %v2324_v6 = vcombine.low %v560_v60, %v568_v61  ;;  %v2445_v60 = vmov 1983009808  }
  0xc5   : > { %1898 = vmatprep.subr.bf16.mxu1 %v2323_v9  ;;  %v2341_v9 = vcombine.high %v576_v3, %v584_v4  ;;  %v2086_v61 = vunpack.c.l.s4 %v2445_v60 }
  0xc6   : > { %1858 = vmatpush1.bf16.msra.mxu0 %v2320_v10  ;;  %v2326_v10 = vcombine.low %v561_v63, %v569_v0 }
  0xc7   : > { %1859 = vmatprep.subr.bf16.mxu0 %v2337_v13  ;;  %v2343_v13 = vcombine.high %v577_v7, %v585_v8  ;;  %v2087_v8 = vunpack.c.0.s8 %v2086_v61 }
  0xc8   : > { %1899 = vmatpush1.bf16.msra.mxu1 %v2322_v14  ;;  %v2340_v14 = vcombine.low %v576_v3, %v584_v4 }
  0xc9   : > { %1900 = vmatprep.subr.bf16.mxu1 %v2339_v17  ;;  %v2357_v17 = vcombine.high %v592_v11, %v600_v12 }
  0xca   : > { %1860 = vmatpush1.bf16.msra.mxu0 %v2336_v18  ;;  %v2356_v18 = vcombine.low %v592_v11, %v600_v12 }
  0xcb   : > { %2368 = vmatprep.subr.msk.bf16.mxu0 %vm1636_vm2, %v2353_v21  ;;  %v2358_v21 = vcombine.low %v593_v15, %v601_v16 }
  0xcc   : > { %1901 = vmatpush1.bf16.msra.mxu1 %v2338_v23  ;;  %v1674_v22 = vsel %vm1636_vm2, %v2356_v18, 0  ;;  %v2988_v18 = vsub.s32 %v2087_v8, %v2744_v52 }
  0xcd   : > { %2370 = vmatprep.subr.msk.bf16.mxu1 %vm1636_vm2, %v2355_v26  ;;  %v1680_v23 = vsel %vm1636_vm2, %v2358_v21, 0 }
  0xce   : > { %1862 = vmatpush1.bf16.msra.mxu0 %v1662_v30 }
  0xcf   : > { %1931 = vmatprep.subr.bf16.mxu0 %v2261_v31 }
  0xd0   : > { %1903 = vmatpush1.bf16.msra.mxu1 %v1668_v34 }
  0xd1   : > { %2369 = vmatmul.mubr.msk.bf16.vlgmr.msra.gmra.mrb[24].mxu0 %vm1632_vm3, %v2849_v42  ;;  %1972 = vmatprep.subr.bf16.mxu1 %v2263_v35 }
  0xd2   : > { %1932 = vmatpush1.bf16.msra.mxu0 %v2260_v36  ;;  %1963 = vmatprep.mubr.bf16.mxu0 %v2444_v51 }
  0xd3   : > { %2371 = vmatmul.mubr.msk.bf16.vlgmr.msra.gmra.mrb[24].mxu1 %vm1632_vm3, %v2849_v42  ;;  %1933 = vmatprep.subr.bf16.mxu0 %v2277_v39 }
  0xd4   : > { %1973 = vmatpush1.bf16.msra.mxu1 %v2262_v40  ;;  %2004 = vmatprep.mubr.bf16.mxu1 %v2444_v51  ;;  %v2308_v51 = vcombine.low %v544_v50, %v552_v53 }
  0xd5   : > { %1974 = vmatprep.subr.bf16.mxu1 %v2279_v44 }
  0xd6   : > { %1934 = vmatpush1.bf16.msra.mxu0 %v2276_v45 }
  0xd7   : > { %1935 = vmatprep.subr.bf16.mxu0 %v2293_v48 }
  0xd8   : > { %1975 = vmatpush1.bf16.msra.mxu1 %v2278_v49 }
  0xd9   : > { %1976 = vmatprep.subr.bf16.mxu1 %v2295_v54 }
  0xda   : > { %1936 = vmatpush1.bf16.msra.mxu0 %v2292_v55 }
  0xdb   : > { %1937 = vmatprep.subr.bf16.mxu0 %v2309_v58 }
  0xdc   : > { %1977 = vmatpush1.bf16.msra.mxu1 %v2294_v59 }
  0xdd   : > { %1978 = vmatprep.subr.bf16.mxu1 %v2311_v62  ;;  %v2981_v59 = vpop.permute.xlu0 %2016 }
  0xde   : > { %1938 = vmatpush1.bf16.msra.mxu0 %v2308_v51 }
  0xdf   : > { %1939 = vmatprep.subr.bf16.mxu0 %v2325_v1 }
  0xe0   : > { %1979 = vmatpush1.bf16.msra.mxu1 %v2310_v2 }
  0xe1   : > { %1980 = vmatprep.subr.bf16.mxu1 %v2327_v5 }
  0xe2   : > { %1940 = vmatpush1.bf16.msra.mxu0 %v2324_v6 }
  0xe3   : > { %1941 = vmatprep.subr.bf16.mxu0 %v2341_v9 }
  0xe4   : > { %1981 = vmatpush1.bf16.msra.mxu1 %v2326_v10 }
  0xe5   : > { %1982 = vmatprep.subr.bf16.mxu1 %v2343_v13 }
  0xe6   : > { %1942 = vmatpush1.bf16.msra.mxu0 %v2340_v14 }
  0xe7   : > { %2372 = vmatprep.subr.msk.bf16.mxu0 %vm1636_vm2, %v2357_v17 }
  0xe8   : > { %1983 = vmatpush1.bf16.msra.mxu1 %v2342_v19 }
  0xe9   : > { %2374 = vmatprep.subr.msk.bf16.mxu1 %vm1636_vm2, %v2359_v20 }
  0xea   : > { %1944 = vmatpush1.bf16.msra.mxu0 %v1674_v22 }
  0xec   : > { %1985 = vmatpush1.bf16.msra.mxu1 %v1680_v23 }
  0xed   : > { %2373 = vmatmul.mubr.msk.bf16.vlgmr.msra.gmra.mrb[28].mxu0 %vm1632_vm3, %v2849_v42 }
  0xef   : > { %2375 = vmatmul.mubr.msk.bf16.vlgmr.msra.gmra.mrb[28].mxu1 %vm1632_vm3, %v2849_v42 }
 0x138   : > { %v794_v24 = vpop.f32.mrb[0].mxu0 }
 0x139   : > { %v796_v25 = vpop.f32.mrb[1].mxu0 }
 0x13a   : > { %v798_v26 = vpop.f32.mrb[2].mxu0  ;;  %v835_v27 = vpop.f32.mrb[0].mxu1 }
 0x13b   : > { %v799_v28 = vpop.f32.mrb[3].mxu0  ;;  %v837_v29 = vpop.f32.mrb[1].mxu1 }
 0x13c   : > { %v839_v30 = vpop.f32.mrb[2].mxu1 }
 0x13d   : > { %v840_v31 = vpop.f32.mrb[3].mxu1 }
 0x140   : > { %v876_v32 = vpop.f32.mrb[4].mxu0 }
 0x141   : > { %v878_v33 = vpop.f32.mrb[5].mxu0 }
 0x142   : > { %v880_v34 = vpop.f32.mrb[6].mxu0  ;;  %v917_v35 = vpop.f32.mrb[4].mxu1 }
 0x143   : > { %v881_v36 = vpop.f32.mrb[7].mxu0  ;;  %v2963_v37 = vpop.f32.mrb[5].mxu1 }
 0x144   : > { %v921_v38 = vpop.f32.mrb[6].mxu1 }
 0x145   : > { %v922_v39 = vpop.f32.mrb[7].mxu1 }
 0x148   : > { %v2965_v40 = vpop.f32.mrb[8].mxu0 }
 0x149   : > { %v2967_v42 = vpop.f32.mrb[9].mxu0 }
 0x14a   : > { %v962_v41 = vpop.f32.mrb[10].mxu0  ;;  %v2969_v43 = vpop.f32.mrb[8].mxu1 }
 0x14b   : > { %v963_v44 = vpop.f32.mrb[11].mxu0  ;;  %v2971_v45 = vpop.f32.mrb[9].mxu1 }
 0x14c   : > { %v1003_v46 = vpop.f32.mrb[10].mxu1 }
 0x14d   : > { %v1004_v47 = vpop.f32.mrb[11].mxu1 }
 0x150   : > { %v2973_v48 = vpop.f32.mrb[12].mxu0 }
 0x151   : > { %v2975_v49 = vpop.f32.mrb[13].mxu0 }
 0x152   : > { %v1044_v50 = vpop.f32.mrb[14].mxu0  ;;  %v2977_v53 = vpop.f32.mrb[12].mxu1 }
 0x153   : > { %v1045_v54 = vpop.f32.mrb[15].mxu0  ;;  %v2979_v55 = vpop.f32.mrb[13].mxu1 }
 0x154   : > { %v1085_v56 = vpop.f32.mrb[14].mxu1 }
 0x155   : > { %v1086_v57 = vpop.f32.mrb[15].mxu1 }
 0x16c   : > { %v1719_v58 = vpop.f32.mrb[16].mxu0 }
 0x16d   : > { %v1720_v62 = vadd.f32 %v1719_v58, %v794_v24  ;;  %v1721_v51 = vpop.f32.mrb[17].mxu0 }
 0x16e   : > { %v1722_v63 = vadd.f32 %v1721_v51, %v796_v25  ;;  %v1760_v0 = vpop.f32.mrb[16].mxu1  ;;  %v1723_v1 = vpop.f32.mrb[18].mxu0 }
 0x16f   : > { %v1761_v2 = vadd.f32 %v1760_v0, %v835_v27  ;;  %v1762_v3 = vpop.f32.mrb[17].mxu1  ;;  %v2019_v4 = vadd.f32 %v2981_v59, %v1720_v62  ;;  %v1724_v5 = vpop.f32.mrb[19].mxu0 }
 0x170   : > { %v1763_v6 = vadd.f32 %v1762_v3, %v837_v29  ;;  %v2020_v7 = vadd.f32 %v2981_v59, %v1722_v63  ;;  %v1764_v9 = vpop.f32.mrb[18].mxu1 }
 0x171   : > { %v2021_v10 = vadd.f32 %v2981_v59, %v1761_v2  ;;  %v2035_v11 = vmax.f32 %v2019_v4, 0.0  ;;  %v1765_v12 = vpop.f32.mrb[19].mxu1 }
 0x172   : > { %v2022_v13 = vadd.f32 %v2981_v59, %v1763_v6  ;;  %v2036_v14 = vmax.f32 %v2020_v7, 0.0 }
 0x173   : > { %v2037_v15 = vmax.f32 %v2021_v10, 0.0 }
 0x174   : > { %v2038_v16 = vmax.f32 %v2022_v13, 0.0  ;;  %v2376_v17 = vpack.c.bf16 %v2036_v14, %v2035_v11 }
 0x176   : > { %v2377_v19 = vpack.c.bf16 %v2038_v16, %v2037_v15  ;;  %v2091_v20 = vrot.slane %v2376_v17, %v2988_v18 }
 0x178   : > { %v2098_v21 = vrot.slane %v2377_v19, %v2988_v18 }
 0x17a   : > { %v2099_v22 = vcombine.low %v2091_v20, %v2098_v21 }
 0x17c   : > { %2155 = vst [vmem:[%s2996_s27] sm:$0xff] %v2099_v22 }
 0x188   : > { %v1801_v23 = vpop.f32.mrb[20].mxu0 }
 0x189   : > { %v1802_v24 = vadd.f32 %v1801_v23, %v876_v32  ;;  %v1803_v25 = vpop.f32.mrb[21].mxu0 }
 0x18a   : > { %v1804_v26 = vadd.f32 %v1803_v25, %v878_v33  ;;  %v1842_v52 = vpop.f32.mrb[20].mxu1  ;;  %v1805_v27 = vpop.f32.mrb[22].mxu0 }
 0x18b   : > { %v2023_v28 = vadd.f32 %v2981_v59, %v1802_v24  ;;  %v1843_v29 = vadd.f32 %v1842_v52, %v917_v35  ;;  %v1844_v30 = vpop.f32.mrb[21].mxu1  ;;  %v1806_v31 = vpop.f32.mrb[23].mxu0 }
 0x18c   : > { %v2024_v34 = vadd.f32 %v2981_v59, %v1804_v26  ;;  %v1845_v36 = vadd.f32 %v1844_v30, %v2963_v37  ;;  %v1846_v38 = vpop.f32.mrb[22].mxu1 }
 0x18d   : > { %v2039_v39 = vmax.f32 %v2023_v28, 0.0  ;;  %v2025_v41 = vadd.f32 %v2981_v59, %v1843_v29  ;;  %v1847_v44 = vpop.f32.mrb[23].mxu1 }
 0x18e   : > { %v2040_v32 = vmax.f32 %v2024_v34, 0.0  ;;  %v2026_v33 = vadd.f32 %v2981_v59, %v1845_v36 }
 0x18f   : > { %v2041_v46 = vmax.f32 %v2025_v41, 0.0 }
 0x190   : > { %v2378_v47 = vpack.c.bf16 %v2040_v32, %v2039_v39  ;;  %v2042_v50 = vmax.f32 %v2026_v33, 0.0 }
 0x192   : > { %v2379_v54 = vpack.c.bf16 %v2042_v50, %v2041_v46  ;;  %v2108_v35 = vrot.slane %v2378_v47, %v2988_v18 }
 0x194   : > { %v2115_v56 = vrot.slane %v2379_v54, %v2988_v18 }
 0x196   : > { %v2116_v57 = vcombine.low %v2108_v35, %v2115_v56 }
 0x198   : > { %2156 = vst [vmem:[%s2996_s27 + $0x8] sm:$0xff] %v2116_v57 }
 0x1a4   : > { %v1883_v58 = vpop.f32.mrb[24].mxu0 }
 0x1a5   : > { %v1884_v37 = vadd.f32 %v1883_v58, %v2965_v40  ;;  %v1885_v60 = vpop.f32.mrb[25].mxu0 }
 0x1a6   : > { %v1886_v61 = vadd.f32 %v1885_v60, %v2967_v42  ;;  %v1924_v62 = vpop.f32.mrb[24].mxu1  ;;  %v1887_v51 = vpop.f32.mrb[26].mxu0 }
 0x1a7   : > { %v2027_v63 = vadd.f32 %v2981_v59, %v1884_v37  ;;  %v1925_v0 = vadd.f32 %v1924_v62, %v2969_v43  ;;  %v1926_v1 = vpop.f32.mrb[25].mxu1  ;;  %v1888_v2 = vpop.f32.mrb[27].mxu0 }
 0x1a8   : > { %v2028_v3 = vadd.f32 %v2981_v59, %v1886_v61  ;;  %v1927_v4 = vadd.f32 %v1926_v1, %v2971_v45  ;;  %v1928_v5 = vpop.f32.mrb[26].mxu1 }
 0x1a9   : > { %v2043_v6 = vmax.f32 %v2027_v63, 0.0  ;;  %v2029_v40 = vadd.f32 %v2981_v59, %v1925_v0  ;;  %v1929_v7 = vpop.f32.mrb[27].mxu1 }
 0x1aa   : > { %v2044_v8 = vmax.f32 %v2028_v3, 0.0  ;;  %v2030_v42 = vadd.f32 %v2981_v59, %v1927_v4 }
 0x1ab   : > { %v2045_v9 = vmax.f32 %v2029_v40, 0.0 }
 0x1ac   : > { %v2380_v10 = vpack.c.bf16 %v2044_v8, %v2043_v6  ;;  %v2046_v11 = vmax.f32 %v2030_v42, 0.0 }
 0x1ae   : > { %v2381_v12 = vpack.c.bf16 %v2046_v11, %v2045_v9  ;;  %v2125_v43 = vrot.slane %v2380_v10, %v2988_v18 }
 0x1b0   : > { %v2132_v13 = vrot.slane %v2381_v12, %v2988_v18 }
 0x1b2   : > { %v2133_v14 = vcombine.low %v2125_v43, %v2132_v13 }
 0x1b4   : > { %2157 = vst [vmem:[%s2996_s27 + $0x10] sm:$0xff] %v2133_v14 }
 0x1c0   : > { %v1965_v15 = vpop.f32.mrb[28].mxu0 }
 0x1c1   : > { %v1966_v45 = vadd.f32 %v1965_v15, %v2973_v48  ;;  %v1967_v16 = vpop.f32.mrb[29].mxu0 }
 0x1c2   : > { %v1968_v17 = vadd.f32 %v1967_v16, %v2975_v49  ;;  %v1969_v19 = vpop.f32.mrb[30].mxu0  ;;  %v2006_v20 = vpop.f32.mrb[28].mxu1 }
 0x1c3   : > { %v2031_v21 = vadd.f32 %v2981_v59, %v1966_v45  ;;  %v2007_v22 = vadd.f32 %v2006_v20, %v2977_v53  ;;  %v1970_v23 = vpop.f32.mrb[31].mxu0  ;;  %v2008_v24 = vpop.f32.mrb[29].mxu1 }
 0x1c4   : > { %v2032_v25 = vadd.f32 %v2981_v59, %v1968_v17  ;;  %v2009_v26 = vadd.f32 %v2008_v24, %v2979_v55  ;;  %v2010_v52 = vpop.f32.mrb[30].mxu1 }
 0x1c5   : > { %v2047_v27 = vmax.f32 %v2031_v21, 0.0  ;;  %v2033_v48 = vadd.f32 %v2981_v59, %v2007_v22  ;;  %v2011_v28 = vpop.f32.mrb[31].mxu1 }
 0x1c6   : > { %v2048_v29 = vmax.f32 %v2032_v25, 0.0  ;;  %v2034_v49 = vadd.f32 %v2981_v59, %v2009_v26 }
 0x1c7   : > { %v2049_v30 = vmax.f32 %v2033_v48, 0.0 }
 0x1c8   : > { %v2382_v31 = vpack.c.bf16 %v2048_v29, %v2047_v27  ;;  %v2050_v34 = vmax.f32 %v2034_v49, 0.0 }
 0x1ca   : > { %v2383_v36 = vpack.c.bf16 %v2050_v34, %v2049_v30  ;;  %v2142_v53 = vrot.slane %v2382_v31, %v2988_v18 }
 0x1cc   : > { %v2149_v38 = vrot.slane %v2383_v36, %v2988_v18 }
 0x1ce   : > { %v2150_v39 = vcombine.low %v2142_v53, %v2149_v38 }
 0x1d0   : > { %2158 = vst [vmem:[%s2996_s27 + $0x18] sm:$0xff] %v2150_v39 }
 0x1d1 PF: > { %p12_p9 = scmp.ge.s32.totalorder %s2493_s22, 4   ;;  %s3045_s18 = smov %s2437_s19 }
 0x1d2   : > { %s3046_s19 = smov %s2502_s25  ;;  %s3047_s20 = smov %s2493_s22 }
 0x1d3   :  { %14 = sbr.rel (!%p12_p9) target bundleno = 2 (0x2), region = 101 }

// kernel: pure3d_fwd.6
= control target key start
LH: loop header
LB: loop body
LE: loop exit
PB: predicated region body
PF: predicated region fallthrough
CT: control target
= control target key end

     0   :  { %v391_v1 = vmov 0   ;;  %vm190_vm0 = vcmask 1045504   ;;  %vm186_vm1 = vcmask 883712   ;;  %s508_s1 = inlined_call_operand.vmem [shape: bf16[108,512], index: 1, kind: input, shape index: {}]   ;;  %s509_s2 = inlined_call_operand.vmem [shape: f32[8,1], index: 2, kind: input, shape index: {}]   ;;  %s510_s0 = inlined_call_operand.vmem [shape: bf16[8,108], index: 0, kind: input, shape index: {}]   ;;  %s511_s3 = inlined_call_operand.vmem [shape: bf16[8,512], index: 3, kind: output, shape index: {}]  }
   0x1   :  { %v349_v0 = vld [vmem:[%s508_s1 + $0x4] ss:$16 sps:$4 sm:$0xff]   ;;  %235 = vmatprep.mubr.bf16.mxu0 %v391_v1  ;;  %276 = vmatprep.mubr.bf16.mxu1 %v391_v1  ;;  %v351_v2 = vld [vmem:[%s508_s1 + $0xc] ss:$16 sps:$4 sm:$0xff]   ;;  %v353_v3 = vld [vmem:[%s508_s1] ss:$16 sps:$4 sm:$0xff]  }
   0x2   :  { %348 = vset.pattern.permute.xlu0 %v391_v1  ;;  %203 = vmatprep.subr.bf16.mxu0 %v349_v0  ;;  %v354_v4 = vld [vmem:[%s508_s1 + $0x8] ss:$16 sps:$4 sm:$0xff]   ;;  %v355_v5 = vld [vmem:[%s508_s1 + $0x24] ss:$16 sps:$4 sm:$0xff]   ;;  %v357_v6 = vld [vmem:[%s508_s1 + $0x2c] ss:$16 sps:$4 sm:$0xff]  }
   0x3   :  { %244 = vmatprep.subr.bf16.mxu1 %v351_v2  ;;  %204 = vmatpush1.bf16.msra.mxu0 %v353_v3  ;;  %v359_v7 = vld [vmem:[%s508_s1 + $0x20] ss:$16 sps:$4 sm:$0xff]   ;;  %v360_v8 = vld [vmem:[%s508_s1 + $0x28] ss:$16 sps:$4 sm:$0xff]   ;;  %v361_v9 = vld [vmem:[%s508_s1 + $0x44] ss:$16 sps:$4 sm:$0xff]  }
   0x4   :  { %245 = vmatpush1.bf16.msra.mxu1 %v354_v4  ;;  %205 = vmatprep.subr.bf16.mxu0 %v355_v5  ;;  %v363_v10 = vld [vmem:[%s508_s1 + $0x4c] ss:$16 sps:$4 sm:$0xff]   ;;  %v365_v11 = vld [vmem:[%s508_s1 + $0x40] ss:$16 sps:$4 sm:$0xff]   ;;  %v366_v12 = vld [vmem:[%s508_s1 + $0x48] ss:$16 sps:$4 sm:$0xff]  }
   0x5   :  { %246 = vmatprep.subr.bf16.mxu1 %v357_v6  ;;  %v367_v13 = vld [vmem:[%s508_s1 + $0x64] ss:$16 sps:$4 sm:$0xff]   ;;  %v369_v14 = vld [vmem:[%s508_s1 + $0x6c] ss:$16 sps:$4 sm:$0xff]   ;;  %v371_v15 = vld [vmem:[%s508_s1 + $0x60] ss:$16 sps:$4 sm:$0xff]  }
   0x6   :  { %v372_v16 = vld [vmem:[%s508_s1 + $0x68] ss:$16 sps:$4 sm:$0xff]   ;;  %v373_v17 = vld [vmem:[%s508_s1 + $0x84] ss:$16 sps:$4 sm:$0xff]   ;;  %v375_v18 = vld [vmem:[%s508_s1 + $0x8c] ss:$16 sps:$4 sm:$0xff]  }
   0x7   :  { %206 = vmatpush1.bf16.msra.mxu0 %v359_v7  ;;  %v377_v19 = vld [vmem:[%s508_s1 + $0x80] ss:$16 sps:$4 sm:$0xff]   ;;  %v378_v20 = vld [vmem:[%s508_s1 + $0x88] ss:$16 sps:$4 sm:$0xff]   ;;  %v379_v21 = vld [vmem:[%s508_s1 + $0xa4] ss:$16 sps:$4 sm:$0xff]  }
   0x8   :  { %247 = vmatpush1.bf16.msra.mxu1 %v360_v8  ;;  %207 = vmatprep.subr.bf16.mxu0 %v361_v9  ;;  %v381_v22 = vld [vmem:[%s508_s1 + $0xac] ss:$16 sps:$4 sm:$0xff]   ;;  %v383_v23 = vld [vmem:[%s508_s1 + $0xa0] ss:$16 sps:$4 sm:$0xff]   ;;  %v384_v24 = vld [vmem:[%s508_s1 + $0xa8] ss:$16 sps:$4 sm:$0xff]  }
   0x9   :  { %248 = vmatprep.subr.bf16.mxu1 %v363_v10  ;;  %v44_v25 = vld [vmem:[%s509_s2] sm:$0xff]  ;;  %v387_v27 = vld [vmem:[%s508_s1 + $0xcc] ss:$16 sps:$4 sm:$0x3f]  }
   0xa   :  { %v385_v26 = vld [vmem:[%s508_s1 + $0xc4] ss:$16 sps:$4 sm:$0x3f]   ;;  %v389_v28 = vld [vmem:[%s508_s1 + $0xc0] ss:$16 sps:$4 sm:$0x3f]   ;;  %47 = vperm.xlu0 %348, %v44_v25  }
   0xb   :  { %208 = vmatpush1.bf16.msra.mxu0 %v365_v11  ;;  %v390_v29 = vld [vmem:[%s508_s1 + $0xc8] ss:$16 sps:$4 sm:$0x3f]   ;;  %v192_v30 = vsel %vm190_vm0, %v389_v28, 0  ;;  %v15_v32 = vld [vmem:[%s510_s0] sm:$0xf] }
   0xc   :  { %249 = vmatpush1.bf16.msra.mxu1 %v366_v12  ;;  %209 = vmatprep.subr.bf16.mxu0 %v367_v13  ;;  %v198_v31 = vsel %vm190_vm0, %v390_v29, 0 }
   0xd   :  { %250 = vmatprep.subr.bf16.mxu1 %v369_v14 }
   0xf   :  { %210 = vmatpush1.bf16.msra.mxu0 %v371_v15 }
  0x10   :  { %251 = vmatpush1.bf16.msra.mxu1 %v372_v16  ;;  %211 = vmatprep.subr.bf16.mxu0 %v373_v17 }
  0x11   :  { %252 = vmatprep.subr.bf16.mxu1 %v375_v18 }
  0x13   :  { %212 = vmatpush1.bf16.msra.mxu0 %v377_v19 }
  0x14   :  { %253 = vmatpush1.bf16.msra.mxu1 %v378_v20  ;;  %213 = vmatprep.subr.bf16.mxu0 %v379_v21 }
  0x15   :  { %254 = vmatprep.subr.bf16.mxu1 %v381_v22 }
  0x17   :  { %214 = vmatpush1.bf16.msra.mxu0 %v383_v23 }
  0x18   :  { %255 = vmatpush1.bf16.msra.mxu1 %v384_v24  ;;  %339 = vmatprep.subr.msk.bf16.mxu0 %vm190_vm0, %v385_v26 }
  0x19   :  { %341 = vmatprep.subr.msk.bf16.mxu1 %vm190_vm0, %v387_v27 }
  0x1b   :  { %216 = vmatpush1.bf16.msra.mxu0 %v192_v30 }
  0x1c   :  { %257 = vmatpush1.bf16.msra.mxu1 %v198_v31 }
  0x1e   :  { %340 = vmatmul.mubr.msk.bf16.vlgmr.msra.gmra.mrb[0].mxu0 %vm186_vm1, %v15_v32 }
  0x1f   :  { %342 = vmatmul.mubr.msk.bf16.vlgmr.msra.gmra.mrb[0].mxu1 %vm186_vm1, %v15_v32 }
  0x89   :  { %v48_v33 = vpop.permute.xlu0 %47 }
  0xf1   :  { %v237_v34 = vpop.f32.mrb[0].mxu0 }
  0xf2   :  { %v278_v35 = vpop.f32.mrb[0].mxu1  ;;  %v238_v36 = vadd.f32 %v237_v34, %v48_v33  ;;  %v239_v38 = vpop.f32.mrb[1].mxu0 }
  0xf3   :  { %v279_v37 = vadd.f32 %v278_v35, %v48_v33  ;;  %v280_v39 = vpop.f32.mrb[1].mxu1  ;;  %v240_v40 = vadd.f32 %v239_v38, %v48_v33  ;;  %v241_v42 = vpop.f32.mrb[2].mxu0 }
  0xf4   :  { %v281_v41 = vadd.f32 %v280_v39, %v48_v33  ;;  %v282_v43 = vpop.f32.mrb[2].mxu1  ;;  %v285_v44 = vmax.f32 %v238_v36, 0.0  ;;  %v242_v46 = vpop.f32.mrb[3].mxu0 }
  0xf5   :  { %v287_v45 = vmax.f32 %v279_v37, 0.0  ;;  %v283_v47 = vpop.f32.mrb[3].mxu1  ;;  %v286_v48 = vmax.f32 %v240_v40, 0.0 }
  0xf6   :  { %v288_v49 = vmax.f32 %v281_v41, 0.0 }
  0xf7   :  { %v345_v50 = vpack.c.bf16 %v286_v48, %v285_v44 }
  0xf8   :  { %v346_v51 = vpack.c.bf16 %v288_v49, %v287_v45 }
  0xf9   :  { %305 = vst [vmem:[%s511_s3] sm:$0xff] %v345_v50 }
  0xfa   :  { %306 = vst [vmem:[%s511_s3 + $0x8] sm:$0xff] %v346_v51 }

// kernel: pure3d_fwd.7
= control target key start
LH: loop header
LB: loop body
LE: loop exit
PB: predicated region body
PF: predicated region fallthrough
CT: control target
= control target key end

     0   :  { %v83_v0 = vlaneseq  ;;  %v764_v2 = vmov 1983009808   ;;  %v765_v4 = vmov 0   ;;  %vm100_vm0 = vcmask 1041408   ;;  %s982_s3 = inlined_call_operand.vmem [shape: bf16[4,512], index: 3, kind: input, shape index: {}]   ;;  %s983_s1 = inlined_call_operand.vmem [shape: bf16[216,512], index: 1, kind: input, shape index: {}]   ;;  %s984_s2 = inlined_call_operand.vmem [shape: bf16[8,4], index: 2, kind: input, shape index: {}]   ;;  %s985_s0 = inlined_call_operand.vmem [shape: bf16[8,216], index: 0, kind: input, shape index: {}]   ;;  %s986_s4 = inlined_call_operand.vmem [shape: f32[8,1], index: 4, kind: input, shape index: {}]   ;;  %s987_s5 = inlined_call_operand.vmem [shape: bf16[8,512], index: 5, kind: output, shape index: {}]  }
   0x1   :  { %v77_v1 = vld [vmem:[%s982_s3] sm:$0xff]  ;;  %v81_v3 = vunpack.c.l.s4 %v764_v2  ;;  %145 = vmatprep.mubr.bf16.mxu0 %v765_v4  ;;  %186 = vmatprep.mubr.bf16.mxu1 %v765_v4  ;;  %v685_v16 = vld [vmem:[%s983_s1 + $0xc] ss:$16 sps:$4 sm:$0xff]   ;;  %vm96_vm1 = vcmask 31744   ;;  %v683_v19 = vld [vmem:[%s983_s1 + $0x8] ss:$16 sps:$4 sm:$0xff]  }
   0x2   :  { %v84_v5 = vshrl.u32 %v83_v0, 7  ;;  %678 = vset.pattern.permute.xlu0 %v765_v4  ;;  %v79_v7 = vcombine.high %v77_v1, %v77_v1  ;;  %v682_v15 = vld [vmem:[%s983_s1 + $0x4] ss:$16 sps:$4 sm:$0xff]   ;;  %v76_v17 = vld [vmem:[%s984_s2] sm:$0xf]  ;;  %vm471_vm2 = vcmask 719872  }
   0x3   :  { %v82_v6 = vunpack.c.0.s8 %v81_v3  ;;  %v680_v18 = vld [vmem:[%s983_s1] ss:$16 sps:$4 sm:$0xff]   ;;  %v688_v20 = vld [vmem:[%s983_s1 + $0x24] ss:$16 sps:$4 sm:$0xff]   ;;  %v691_v21 = vld [vmem:[%s983_s1 + $0x2c] ss:$16 sps:$4 sm:$0xff]  }
   0x4   :  { %v686_v22 = vld [vmem:[%s983_s1 + $0x20] ss:$16 sps:$4 sm:$0xff]   ;;  %v689_v23 = vld [vmem:[%s983_s1 + $0x28] ss:$16 sps:$4 sm:$0xff]   ;;  %v694_v24 = vld [vmem:[%s983_s1 + $0x44] ss:$16 sps:$4 sm:$0xff]  }
   0x5   :  { %v85_v8 = vsub.s32 %v82_v6, %v84_v5  ;;  %v697_v25 = vld [vmem:[%s983_s1 + $0x4c] ss:$16 sps:$4 sm:$0xff]   ;;  %v692_v26 = vld [vmem:[%s983_s1 + $0x40] ss:$16 sps:$4 sm:$0xff]   ;;  %v695_v27 = vld [vmem:[%s983_s1 + $0x48] ss:$16 sps:$4 sm:$0xff]  }
   0x6   :  { %v700_v28 = vld [vmem:[%s983_s1 + $0x64] ss:$16 sps:$4 sm:$0xff]   ;;  %v703_v29 = vld [vmem:[%s983_s1 + $0x6c] ss:$16 sps:$4 sm:$0xff]   ;;  %v698_v30 = vld [vmem:[%s983_s1 + $0x60] ss:$16 sps:$4 sm:$0xff]  }
   0x7   :  { %v86_v9 = vrot.slane %v77_v1, %v85_v8  ;;  %v93_v10 = vrot.slane %v79_v7, %v85_v8  ;;  %v701_v31 = vld [vmem:[%s983_s1 + $0x68] ss:$16 sps:$4 sm:$0xff]   ;;  %v706_v32 = vld [vmem:[%s983_s1 + $0x84] ss:$16 sps:$4 sm:$0xff]   ;;  %v709_v33 = vld [vmem:[%s983_s1 + $0x8c] ss:$16 sps:$4 sm:$0xff]  }
   0x8   :  { %v704_v34 = vld [vmem:[%s983_s1 + $0x80] ss:$16 sps:$4 sm:$0xff]   ;;  %v707_v35 = vld [vmem:[%s983_s1 + $0x88] ss:$16 sps:$4 sm:$0xff]   ;;  %v712_v36 = vld [vmem:[%s983_s1 + $0xa4] ss:$16 sps:$4 sm:$0xff]  }
   0x9   :  { %v94_v11 = vcombine.high %v86_v9, %v86_v9  ;;  %v95_v12 = vcombine.high %v93_v10, %v93_v10  ;;  %v102_v13 = vsel %vm100_vm0, %v86_v9, 0  ;;  %v108_v14 = vsel %vm100_vm0, %v93_v10, 0  ;;  %v715_v37 = vld [vmem:[%s983_s1 + $0xac] ss:$16 sps:$4 sm:$0xff]   ;;  %v710_v38 = vld [vmem:[%s983_s1 + $0xa0] ss:$16 sps:$4 sm:$0xff]  }
   0xa   :  { %v713_v39 = vld [vmem:[%s983_s1 + $0xa8] ss:$16 sps:$4 sm:$0xff]   ;;  %v718_v40 = vld [vmem:[%s983_s1 + $0xc4] ss:$16 sps:$4 sm:$0xff]   ;;  %v721_v41 = vld [vmem:[%s983_s1 + $0xcc] ss:$16 sps:$4 sm:$0xff]  }
   0xb   :  { %606 = vmatprep.subr.msk.bf16.mxu0 %vm100_vm0, %v94_v11  ;;  %608 = vmatprep.subr.msk.bf16.mxu1 %vm100_vm0, %v95_v12  ;;  %v716_v42 = vld [vmem:[%s983_s1 + $0xc0] ss:$16 sps:$4 sm:$0xff]   ;;  %v719_v43 = vld [vmem:[%s983_s1 + $0xc8] ss:$16 sps:$4 sm:$0xff]   ;;  %v724_v44 = vld [vmem:[%s983_s1 + $0xe4] ss:$16 sps:$4 sm:$0xff]  }
   0xc   :  { %114 = vmatpush1.bf16.msra.mxu0 %v102_v13  ;;  %155 = vmatpush1.bf16.msra.mxu1 %v108_v14  ;;  %v727_v45 = vld [vmem:[%s983_s1 + $0xec] ss:$16 sps:$4 sm:$0xff]   ;;  %v895_v46 = vld [vmem:[%s985_s0] sm:$0xff]  ;;  %v725_v50 = vld [vmem:[%s983_s1 + $0xe8] ss:$16 sps:$4 sm:$0xff]   ;;  %vm475_vm3 = vcmask 1043456  }
   0xd   :  { %488 = vmatprep.subr.bf16.mxu0 %v682_v15  ;;  %529 = vmatprep.subr.bf16.mxu1 %v685_v16  ;;  %v570_v47 = vld [vmem:[%s986_s4] sm:$0xff]  ;;  %v611_v48 = vcombine.high %v895_v46, %v895_v46  ;;  %v733_v52 = vld [vmem:[%s983_s1 + $0x10c] ss:$16 sps:$4 sm:$0xff]   ;;  %v731_v54 = vld [vmem:[%s983_s1 + $0x108] ss:$16 sps:$4 sm:$0xff]   ;;  %v610_v15 = vcombine.low %v895_v46, %v895_v46 }
   0xe   :  { %573 = vperm.xlu0 %678, %v570_v47   ;;  %v722_v49 = vld [vmem:[%s983_s1 + $0xe0] ss:$16 sps:$4 sm:$0xff]   ;;  %v730_v51 = vld [vmem:[%s983_s1 + $0x104] ss:$16 sps:$4 sm:$0xff]   ;;  %v739_v56 = vld [vmem:[%s983_s1 + $0x12c] ss:$16 sps:$4 sm:$0xff]  }
   0xf   :  { %607 = vmatmul.mubr.msk.bf16.vlgmr.msra.gmra.mrb[0].mxu0 %vm96_vm1, %v76_v17  ;;  %609 = vmatmul.mubr.msk.bf16.vlgmr.msra.gmra.mrb[0].mxu1 %vm96_vm1, %v76_v17  ;;  %v728_v53 = vld [vmem:[%s983_s1 + $0x100] ss:$16 sps:$4 sm:$0xff]   ;;  %v736_v55 = vld [vmem:[%s983_s1 + $0x124] ss:$16 sps:$4 sm:$0xff]   ;;  %v737_v58 = vld [vmem:[%s983_s1 + $0x128] ss:$16 sps:$4 sm:$0xff]  }
  0x10   :  { %489 = vmatpush1.bf16.msra.mxu0 %v680_v18  ;;  %530 = vmatpush1.bf16.msra.mxu1 %v683_v19  ;;  %v734_v57 = vld [vmem:[%s983_s1 + $0x120] ss:$16 sps:$4 sm:$0xff]   ;;  %v742_v59 = vld [vmem:[%s983_s1 + $0x144] ss:$16 sps:$4 sm:$0xff]   ;;  %v745_v60 = vld [vmem:[%s983_s1 + $0x14c] ss:$16 sps:$4 sm:$0xff]  }
  0x11   :  { %490 = vmatprep.subr.bf16.mxu0 %v688_v20  ;;  %531 = vmatprep.subr.bf16.mxu1 %v691_v21  ;;  %v740_v61 = vld [vmem:[%s983_s1 + $0x140] ss:$16 sps:$4 sm:$0xff]   ;;  %v743_v62 = vld [vmem:[%s983_s1 + $0x148] ss:$16 sps:$4 sm:$0xff]   ;;  %v748_v63 = vld [vmem:[%s983_s1 + $0x164] ss:$16 sps:$4 sm:$0xff]  }
  0x12   :  { %669 = vmatprep.mubr.msk.bf16.mxu0 %vm471_vm2, %v611_v48  ;;  %671 = vmatprep.mubr.msk.bf16.mxu1 %vm471_vm2, %v611_v48  ;;  %v751_v0 = vld [vmem:[%s983_s1 + $0x16c] ss:$16 sps:$4 sm:$0xff]   ;;  %v746_v1 = vld [vmem:[%s983_s1 + $0x160] ss:$16 sps:$4 sm:$0xff]   ;;  %v749_v2 = vld [vmem:[%s983_s1 + $0x168] ss:$16 sps:$4 sm:$0xff]  }
  0x13   :  { %v754_v3 = vld [vmem:[%s983_s1 + $0x184] ss:$16 sps:$4 sm:$0xff]   ;;  %v757_v4 = vld [vmem:[%s983_s1 + $0x18c] ss:$16 sps:$4 sm:$0xff]   ;;  %v752_v7 = vld [vmem:[%s983_s1 + $0x180] ss:$16 sps:$4 sm:$0xff]  }
  0x14   :  { %491 = vmatpush1.bf16.msra.mxu0 %v686_v22  ;;  %532 = vmatpush1.bf16.msra.mxu1 %v689_v23  ;;  %v74_v5 = vld [vmem:[%s983_s1 + $0x1a0] sm:$0xff]  ;;  %v75_v6 = vld [vmem:[%s983_s1 + $0x1a8] sm:$0xff] }
  0x15   :  { %492 = vmatprep.subr.bf16.mxu0 %v694_v24  ;;  %533 = vmatprep.subr.bf16.mxu1 %v697_v25  ;;  %v755_v8 = vld [vmem:[%s983_s1 + $0x188] ss:$16 sps:$4 sm:$0xff]   ;;  %v665_v9 = vcombine.high %v74_v5, %v74_v5  ;;  %v667_v10 = vcombine.high %v75_v6, %v75_v6  ;;  %v664_v11 = vcombine.low %v74_v5, %v74_v5 }
  0x16   :  { %v666_v12 = vcombine.low %v75_v6, %v75_v6 }
  0x17   :  { %v477_v13 = vsel %vm475_vm3, %v664_v11, 0 }
  0x18   :  { %493 = vmatpush1.bf16.msra.mxu0 %v692_v26  ;;  %534 = vmatpush1.bf16.msra.mxu1 %v695_v27  ;;  %v483_v14 = vsel %vm475_vm3, %v666_v12, 0 }
  0x19   :  { %494 = vmatprep.subr.bf16.mxu0 %v700_v28  ;;  %535 = vmatprep.subr.bf16.mxu1 %v703_v29 }
  0x1c   :  { %495 = vmatpush1.bf16.msra.mxu0 %v698_v30  ;;  %536 = vmatpush1.bf16.msra.mxu1 %v701_v31 }
  0x1d   :  { %496 = vmatprep.subr.bf16.mxu0 %v706_v32  ;;  %537 = vmatprep.subr.bf16.mxu1 %v709_v33 }
  0x20   :  { %497 = vmatpush1.bf16.msra.mxu0 %v704_v34  ;;  %538 = vmatpush1.bf16.msra.mxu1 %v707_v35 }
  0x21   :  { %498 = vmatprep.subr.bf16.mxu0 %v712_v36  ;;  %539 = vmatprep.subr.bf16.mxu1 %v715_v37 }
  0x24   :  { %499 = vmatpush1.bf16.msra.mxu0 %v710_v38  ;;  %540 = vmatpush1.bf16.msra.mxu1 %v713_v39 }
  0x25   :  { %500 = vmatprep.subr.bf16.mxu0 %v718_v40  ;;  %541 = vmatprep.subr.bf16.mxu1 %v721_v41 }
  0x28   :  { %501 = vmatpush1.bf16.msra.mxu0 %v716_v42  ;;  %542 = vmatpush1.bf16.msra.mxu1 %v719_v43 }
  0x29   :  { %502 = vmatprep.subr.bf16.mxu0 %v724_v44  ;;  %543 = vmatprep.subr.bf16.mxu1 %v727_v45 }
  0x2c   :  { %503 = vmatpush1.bf16.msra.mxu0 %v722_v49  ;;  %544 = vmatpush1.bf16.msra.mxu1 %v725_v50 }
  0x2d   :  { %504 = vmatprep.subr.bf16.mxu0 %v730_v51  ;;  %545 = vmatprep.subr.bf16.mxu1 %v733_v52 }
  0x30   :  { %505 = vmatpush1.bf16.msra.mxu0 %v728_v53  ;;  %546 = vmatpush1.bf16.msra.mxu1 %v731_v54 }
  0x31   :  { %506 = vmatprep.subr.bf16.mxu0 %v736_v55  ;;  %547 = vmatprep.subr.bf16.mxu1 %v739_v56 }
  0x34   :  { %507 = vmatpush1.bf16.msra.mxu0 %v734_v57  ;;  %548 = vmatpush1.bf16.msra.mxu1 %v737_v58 }
  0x35   :  { %508 = vmatprep.subr.bf16.mxu0 %v742_v59  ;;  %549 = vmatprep.subr.bf16.mxu1 %v745_v60 }
  0x38   :  { %509 = vmatpush1.bf16.msra.mxu0 %v740_v61  ;;  %550 = vmatpush1.bf16.msra.mxu1 %v743_v62 }
  0x39   :  { %510 = vmatprep.subr.bf16.mxu0 %v748_v63  ;;  %551 = vmatprep.subr.bf16.mxu1 %v751_v0 }
  0x3c   :  { %511 = vmatpush1.bf16.msra.mxu0 %v746_v1  ;;  %552 = vmatpush1.bf16.msra.mxu1 %v749_v2 }
  0x3d   :  { %512 = vmatprep.subr.bf16.mxu0 %v754_v3  ;;  %553 = vmatprep.subr.bf16.mxu1 %v757_v4 }
  0x40   :  { %513 = vmatpush1.bf16.msra.mxu0 %v752_v7  ;;  %554 = vmatpush1.bf16.msra.mxu1 %v755_v8 }
  0x41   :  { %668 = vmatprep.subr.msk.bf16.mxu0 %vm475_vm3, %v665_v9  ;;  %670 = vmatprep.subr.msk.bf16.mxu1 %vm475_vm3, %v667_v10 }
  0x44   :  { %515 = vmatpush1.bf16.msra.mxu0 %v477_v13  ;;  %556 = vmatpush1.bf16.msra.mxu1 %v483_v14 }
  0x47   :  { %521 = vmatmul.mubr.bf16.vlgmr.msra.gmra.mrb[4].mxu0 %v610_v15  ;;  %562 = vmatmul.mubr.bf16.vlgmr.msra.gmra.mrb[4].mxu1 %v610_v15 }
  0x8d   :  { %v574_v24 = vpop.permute.xlu0 %573 }
  0xe2   :  { %v147_v16 = vpop.f32.mrb[0].mxu0  ;;  %v188_v17 = vpop.f32.mrb[0].mxu1 }
  0xe3   :  { %v149_v18 = vpop.f32.mrb[1].mxu0  ;;  %v190_v19 = vpop.f32.mrb[1].mxu1 }
  0xe4   :  { %v151_v20 = vpop.f32.mrb[2].mxu0  ;;  %v192_v21 = vpop.f32.mrb[2].mxu1 }
  0xe5   :  { %v152_v22 = vpop.f32.mrb[3].mxu0  ;;  %v193_v23 = vpop.f32.mrb[3].mxu1 }
 0x11a   :  { %v522_v25 = vpop.f32.mrb[4].mxu0  ;;  %v563_v26 = vpop.f32.mrb[4].mxu1 }
 0x11b   :  { %v523_v27 = vadd.f32 %v522_v25, %v147_v16  ;;  %v564_v28 = vadd.f32 %v563_v26, %v188_v17  ;;  %v524_v29 = vpop.f32.mrb[5].mxu0  ;;  %v565_v30 = vpop.f32.mrb[5].mxu1 }
 0x11c   :  { %v525_v31 = vadd.f32 %v524_v29, %v149_v18  ;;  %v566_v32 = vadd.f32 %v565_v30, %v190_v19  ;;  %v526_v33 = vpop.f32.mrb[6].mxu0  ;;  %v567_v34 = vpop.f32.mrb[6].mxu1 }
 0x11d   :  { %v576_v35 = vadd.f32 %v574_v24, %v523_v27  ;;  %v578_v36 = vadd.f32 %v574_v24, %v564_v28  ;;  %v527_v37 = vpop.f32.mrb[7].mxu0  ;;  %v568_v38 = vpop.f32.mrb[7].mxu1 }
 0x11e   :  { %v577_v39 = vadd.f32 %v574_v24, %v525_v31  ;;  %v579_v40 = vadd.f32 %v574_v24, %v566_v32 }
 0x11f   :  { %v580_v41 = vmax.f32 %v576_v35, 0.0  ;;  %v582_v42 = vmax.f32 %v578_v36, 0.0 }
 0x120   :  { %v581_v43 = vmax.f32 %v577_v39, 0.0  ;;  %v583_v44 = vmax.f32 %v579_v40, 0.0 }
 0x122   :  { %v674_v45 = vpack.c.bf16 %v581_v43, %v580_v41  ;;  %v675_v46 = vpack.c.bf16 %v583_v44, %v582_v42 }
 0x124   :  { %600 = vst [vmem:[%s987_s5] sm:$0xff] %v674_v45  ;;  %601 = vst [vmem:[%s987_s5 + $0x8] sm:$0xff] %v675_v46 }

</bundles_post_ra>
